<compile_context>
chip_gen: v5e
topology: v5e:2x2
jax: 0.10.0
libtpu: 0.0.40
codegen_flags: <defaults>
</compile_context>

<pallas_src>
import jax
import jax.numpy as jnp
from jax.experimental import pallas as pl
from jax.experimental.pallas import tpu as pltpu


# ---------------------------------------------------------------------------
# MaxPool1d(kernel=2, stride=2) over the leading (time-major, untiled) axis:
# free reshape + elementwise max of two slabs — no sublane/lane relayouts.
# ---------------------------------------------------------------------------
def _pool2_time(a):
    Tt = a.shape[0]
    a = a.reshape(Tt // 2, 2, *a.shape[1:])
    return jnp.maximum(a[:, 0], a[:, 1])


# ---------------------------------------------------------------------------
# Fused kernel: conv1 -> ReLU -> pool -> conv2 -> ReLU -> pool -> LSTM -> FC
# All activations are time-major (time, Bt, feat); matmuls are explicit 2D.
# ---------------------------------------------------------------------------
def cnn_lstm_kernel(xcol_ref, w1_ref, b1_ref, w2_ref, b2_ref,
                    wih_ref, whh_ref, bg_ref, wfc_ref, bfc_ref, o_ref):
    # xcol_ref: (L1, Bt, F1=K1*Cin) bf16   im2col'd, zero 'same'-padded conv1 input
    # w1_ref:   (F1, C1) bf16              b1_ref:  (1, C1)  f32
    # w2_ref:   (F2=K2*C1, C2) bf16        b2_ref:  (1, C2)  f32
    # wih_ref:  (C2, 4*Hp) bf16            whh_ref: (Hp, 4*Hp) bf16   bg_ref: (1, 4*Hp) f32
    # wfc_ref:  (Hp, NCp) bf16             bfc_ref: (1, NCp) f32
    # o_ref:    (Bt, NCp) f32              (gates/H/NC zero-padded to 128-lane blocks)
    f32 = jnp.float32
    bf16 = jnp.bfloat16

    L1, Bt, F1 = xcol_ref.shape
    C1 = w1_ref.shape[1]
    F2, C2 = w2_ref.shape
    K2 = F2 // C1
    pad2 = (K2 - 1) // 2
    G = wih_ref.shape[1]                    # 4 * Hp
    Hp = whh_ref.shape[0]
    Lh1 = L1 // 2                           # after pool1 == conv2 output length
    T = Lh1 // 2                            # after pool2 == LSTM sequence length

    # ---- conv1 (+bias, ReLU): ONE 2D MXU matmul, M = L1*Bt -------------------
    a1 = jnp.dot(xcol_ref[...].reshape(L1 * Bt, F1), w1_ref[...],
                 preferred_element_type=f32)
    a1 = jnp.maximum(a1 + b1_ref[...], 0.0).reshape(L1, Bt, C1)

    # ---- MaxPool1d(2) over the leading time axis -----------------------------
    p1 = _pool2_time(a1)                                    # (Lh1, Bt, C1) f32

    # ---- conv2 via in-kernel im2col ('same' zero padding): ONE matmul --------
    zpad = jnp.zeros((pad2, Bt, C1), f32)
    p1p = jnp.concatenate([zpad, p1, zpad], axis=0)         # (Lh1 + K2 - 1, Bt, C1)
    xcol2 = jnp.concatenate([p1p[k:k + Lh1] for k in range(K2)], axis=2)
    a2 = jnp.dot(xcol2.reshape(Lh1 * Bt, F2).astype(bf16), w2_ref[...],
                 preferred_element_type=f32)
    a2 = jnp.maximum(a2 + b2_ref[...], 0.0).reshape(Lh1, Bt, C2)

    # ---- MaxPool1d(2) -> LSTM input, time-major (T, Bt, C2) ------------------
    h2 = _pool2_time(a2)

    # ---- LSTM input projection hoisted out of the recurrence: ONE matmul -----
    xproj = jnp.dot(h2.reshape(T * Bt, C2).astype(bf16), wih_ref[...],
                    preferred_element_type=f32)
    xproj = (xproj + bg_ref[...]).reshape(T, Bt, G)

    # ---- recurrence: only h @ W_hh stays serial; gate slices are 128-aligned.
    # Padded gate lanes stay exactly 0 (i/f/o_pad=0.5, g_pad=0 -> c/h pad stays 0).
    whh = whh_ref[...]
    h = jnp.zeros((Bt, Hp), f32)
    c = jnp.zeros((Bt, Hp), f32)
    for t in range(T):                      # statically unrolled, T is tiny
        gates = xproj[t] + jnp.dot(h.astype(bf16), whh, preferred_element_type=f32)
        i = jax.nn.sigmoid(gates[:, 0 * Hp:1 * Hp])
        f = jax.nn.sigmoid(gates[:, 1 * Hp:2 * Hp])
        g = jnp.tanh(gates[:, 2 * Hp:3 * Hp])
        o = jax.nn.sigmoid(gates[:, 3 * Hp:4 * Hp])
        c = f * c + i * g
        h = o * jnp.tanh(c)

    # ---- final Linear on the last hidden state (lane-dense padded output) ----
    out = jnp.dot(h.astype(bf16), wfc_ref[...], preferred_element_type=f32)
    o_ref[...] = out + bfc_ref[...]


# ---------------------------------------------------------------------------
# Batch tile selection.
# ---------------------------------------------------------------------------
def _pick_batch_tile(B, cap=128):
    """Largest multiple-of-8 divisor of B up to `cap` (sublane-aligned blocks,
    free in-kernel reshapes). If that leaves one grid step, halve it when
    possible so both v7x TensorCores get work. Tiny/odd batches fall back to a
    single whole-batch block."""
    bt = 0
    for d in range(8, min(B, cap) + 1, 8):
        if B % d == 0:
            bt = d
    if bt == 0:
        return B
    if B // bt == 1 and bt % 16 == 0:
        bt //= 2
    return bt


# ---------------------------------------------------------------------------
# Wrapper: layout/pad/cast + single pallas_call with a batch-parallel grid.
# ---------------------------------------------------------------------------
def cnn_lstm_forward(x_ncl, params):
    """x_ncl: (B, Cin, L) like PyTorch NCL input. Returns (B, num_classes) f32."""
    B, Cin, L = x_ncl.shape
    conv1_w = params["conv1_w"]            # PyTorch layout (C1, Cin, K1)
    conv2_w = params["conv2_w"]            # (C2, C1, K2)
    C1, _, K1 = conv1_w.shape
    C2, _, K2 = conv2_w.shape
    H = params["lstm_whh"].shape[1]        # weight_hh_l0: (4H, H)
    NC = params["fc_w"].shape[0]

    assert L % 4 == 0, "two MaxPool1d(2) stages require L % 4 == 0"
    # TODO(synk): MaxPool1d floor behavior for lengths not divisible by 4 is not handled.

    # ---- time-major, im2col'd conv1 input: (L, B, K1*Cin), bf16 --------------
    pad1 = (K1 - 1) // 2
    x_lbc = jnp.transpose(x_ncl, (2, 0, 1))                       # (L, B, Cin)
    xpad = jnp.pad(x_lbc, ((pad1, pad1), (0, 0), (0, 0)))
    xcol1 = jnp.concatenate([xpad[k:k + L] for k in range(K1)], axis=2)
    xcol1 = xcol1.astype(jnp.bfloat16)                            # (L, B, F1)
    F1 = K1 * Cin

    # ---- conv weights as (K*Cin, Cout) matmul operands -----------------------
    w1col = jnp.transpose(conv1_w, (2, 1, 0)).reshape(F1, C1).astype(jnp.bfloat16)
    b1 = params["conv1_b"].reshape(1, C1).astype(jnp.float32)
    F2 = K2 * C1
    w2col = jnp.transpose(conv2_w, (2, 1, 0)).reshape(F2, C2).astype(jnp.bfloat16)
    b2 = params["conv2_b"].reshape(1, C2).astype(jnp.float32)

    # ---- LSTM weights with 128-lane-aligned (zero padded) gates --------------
    Hp = ((H + 127) // 128) * 128

    def pad_gates(m):          # (R, 4H) f32 -> (R, 4*Hp): gate j at lanes [j*Hp, j*Hp+H)
        out = jnp.zeros((m.shape[0], 4 * Hp), jnp.float32)
        for j in range(4):
            out = out.at[:, j * Hp:j * Hp + H].set(m[:, j * H:(j + 1) * H])
        return out

    wih_p = pad_gates(params["lstm_wih"].T.astype(jnp.float32)).astype(jnp.bfloat16)
    whh_p = jnp.zeros((Hp, 4 * Hp), jnp.float32).at[:H].set(
        pad_gates(params["lstm_whh"].T.astype(jnp.float32))).astype(jnp.bfloat16)
    bg_p = pad_gates((params["lstm_bih"] + params["lstm_bhh"])
                     .reshape(1, 4 * H).astype(jnp.float32))       # (1, 4*Hp) f32

    # ---- FC weights padded to a lane-dense (Hp, NCp) output ------------------
    NCp = ((NC + 127) // 128) * 128
    wfc_p = jnp.zeros((Hp, NCp), jnp.float32).at[:H, :NC].set(
        params["fc_w"].T.astype(jnp.float32)).astype(jnp.bfloat16)
    bfc_p = jnp.zeros((1, NCp), jnp.float32).at[0, :NC].set(
        params["fc_b"].astype(jnp.float32))

    # ---- batch-parallel grid --------------------------------------------------
    Bt = _pick_batch_tile(B)
    nb = B // Bt

    grid_spec = pltpu.PrefetchScalarGridSpec(
        num_scalar_prefetch=0,
        grid=(nb,),
        in_specs=[
            pl.BlockSpec((L, Bt, F1), lambda b: (0, b, 0)),
            pl.BlockSpec((F1, C1), lambda b: (0, 0)),
            pl.BlockSpec((1, C1), lambda b: (0, 0)),
            pl.BlockSpec((F2, C2), lambda b: (0, 0)),
            pl.BlockSpec((1, C2), lambda b: (0, 0)),
            pl.BlockSpec((C2, 4 * Hp), lambda b: (0, 0)),
            pl.BlockSpec((Hp, 4 * Hp), lambda b: (0, 0)),
            pl.BlockSpec((1, 4 * Hp), lambda b: (0, 0)),
            pl.BlockSpec((Hp, NCp), lambda b: (0, 0)),
            pl.BlockSpec((1, NCp), lambda b: (0, 0)),
        ],
        out_specs=pl.BlockSpec((Bt, NCp), lambda b: (b, 0)),
    )
    out = pl.pallas_call(
        cnn_lstm_kernel,
        out_shape=jax.ShapeDtypeStruct((B, NCp), jnp.float32),
        grid_spec=grid_spec,
        compiler_params=pltpu.CompilerParams(
            dimension_semantics=("parallel",)),
    )(xcol1, w1col, b1, w2col, b2, wih_p, whh_p, bg_p, wfc_p, bfc_p)
    return out[:, :NC]


# ---------------------------------------------------------------------------
# Pure-JAX f32 reference (PyTorch semantics) for correctness check.
# ---------------------------------------------------------------------------
def cnn_lstm_reference(x_ncl, params):
    def conv_relu_pool(x, w, b, pad):
        # x: (B, L, Cin); w: PyTorch layout (Cout, Cin, K)
        B, L, _ = x.shape
        Cout, _, K = w.shape
        xpad = jnp.pad(x, ((0, 0), (pad, pad), (0, 0)))
        acc = jnp.zeros((B, L, Cout), jnp.float32) + b[None, None, :]
        for k in range(K):
            acc = acc + jnp.einsum("blc,oc->blo", xpad[:, k:k + L, :], w[:, :, k])
        acc = jnp.maximum(acc, 0.0)
        return jnp.max(acc.reshape(B, L // 2, 2, Cout), axis=2)

    x = jnp.transpose(x_ncl, (0, 2, 1)).astype(jnp.float32)
    x = conv_relu_pool(x, params["conv1_w"], params["conv1_b"],
                       (params["conv1_w"].shape[2] - 1) // 2)
    x = conv_relu_pool(x, params["conv2_w"], params["conv2_b"],
                       (params["conv2_w"].shape[2] - 1) // 2)

    B, T, _ = x.shape
    H = params["lstm_whh"].shape[1]
    wih, whh = params["lstm_wih"], params["lstm_whh"]
    bg = params["lstm_bih"] + params["lstm_bhh"]
    h = jnp.zeros((B, H), jnp.float32)
    c = jnp.zeros((B, H), jnp.float32)
    for t in range(T):
        gates = x[:, t, :] @ wih.T + h @ whh.T + bg
        i = jax.nn.sigmoid(gates[:, 0 * H:1 * H])
        f = jax.nn.sigmoid(gates[:, 1 * H:2 * H])
        g = jnp.tanh(gates[:, 2 * H:3 * H])
        o = jax.nn.sigmoid(gates[:, 3 * H:4 * H])
        c = f * c + i * g
        h = o * jnp.tanh(c)
    return h @ params["fc_w"].T + params["fc_b"][None, :]


# ---------------------------------------------------------------------------
def init_params(key, num_classes, hidden=64):
    ks = jax.random.split(key, 10)
    s = 0.1
    return {
        # PyTorch parameter layouts
        "conv1_w": s * jax.random.normal(ks[0], (16, 3, 5), jnp.float32),
        "conv1_b": s * jax.random.normal(ks[1], (16,), jnp.float32),
        "conv2_w": s * jax.random.normal(ks[2], (32, 16, 3), jnp.float32),
        "conv2_b": s * jax.random.normal(ks[3], (32,), jnp.float32),
        "lstm_wih": s * jax.random.normal(ks[4], (4 * hidden, 32), jnp.float32),
        "lstm_whh": s * jax.random.normal(ks[5], (4 * hidden, hidden), jnp.float32),
        "lstm_bih": s * jax.random.normal(ks[6], (4 * hidden,), jnp.float32),
        "lstm_bhh": s * jax.random.normal(ks[7], (4 * hidden,), jnp.float32),
        "fc_w": s * jax.random.normal(ks[8], (num_classes, hidden), jnp.float32),
        "fc_b": s * jax.random.normal(ks[9], (num_classes,), jnp.float32),
    }


if __name__ == "__main__":
    num_classes = 10
    B, Cin, L = 16, 3, 16  # seq len after two MaxPool1d(2) = 4; Bt=8 -> 2 grid steps

    key = jax.random.PRNGKey(0)
    kx, kp = jax.random.split(key)
    x = jax.random.normal(kx, (B, Cin, L), jnp.float32)
    params = init_params(kp, num_classes)

    out = jax.block_until_ready(jax.jit(cnn_lstm_forward)(x, params))
    ref = jax.block_until_ready(cnn_lstm_reference(x, params))

    assert out.shape == (B, num_classes), out.shape
    # bf16 MXU inputs (f32 accumulation) => slightly looser tolerance vs f32 reference
    assert jnp.allclose(out, ref, atol=2e-2, rtol=2e-2), (out, ref)
    print("KERNEL_OK")
</pallas_src>

<mosaic_0001>
module attributes {stable_mosaic.version = 11 : i64} {
  func.func @cnn_lstm_kernel(%arg0: i32, %arg1: memref<16x8x15xbf16, #tpu.memory_space<vmem>>, %arg2: memref<15x16xbf16, #tpu.memory_space<vmem>>, %arg3: memref<1x16xf32, #tpu.memory_space<vmem>>, %arg4: memref<48x32xbf16, #tpu.memory_space<vmem>>, %arg5: memref<1x32xf32, #tpu.memory_space<vmem>>, %arg6: memref<32x512xbf16, #tpu.memory_space<vmem>>, %arg7: memref<128x512xbf16, #tpu.memory_space<vmem>>, %arg8: memref<1x512xf32, #tpu.memory_space<vmem>>, %arg9: memref<128x128xbf16, #tpu.memory_space<vmem>>, %arg10: memref<1x128xf32, #tpu.memory_space<vmem>>, %arg11: memref<8x128xf32, #tpu.memory_space<vmem>>) attributes {dimension_semantics = [#tpu.dimension_semantics<parallel>], iteration_bounds = array<i64: 2>, scalar_prefetch = 0 : i64, scratch_operands = 0 : i64, tpu.core_type = #tpu.core_type<tc>, window_params = [{transform_indices = @transform_0, window_bounds = array<i64: 16, 8, 15>}, {pipeline_mode = #tpu.pipeline_mode<synchronous>, transform_indices = @transform_1, window_bounds = array<i64: 15, 16>}, {pipeline_mode = #tpu.pipeline_mode<synchronous>, transform_indices = @transform_2, window_bounds = array<i64: 1, 16>}, {pipeline_mode = #tpu.pipeline_mode<synchronous>, transform_indices = @transform_3, window_bounds = array<i64: 48, 32>}, {pipeline_mode = #tpu.pipeline_mode<synchronous>, transform_indices = @transform_4, window_bounds = array<i64: 1, 32>}, {pipeline_mode = #tpu.pipeline_mode<synchronous>, transform_indices = @transform_5, window_bounds = array<i64: 32, 512>}, {pipeline_mode = #tpu.pipeline_mode<synchronous>, transform_indices = @transform_6, window_bounds = array<i64: 128, 512>}, {pipeline_mode = #tpu.pipeline_mode<synchronous>, transform_indices = @transform_7, window_bounds = array<i64: 1, 512>}, {pipeline_mode = #tpu.pipeline_mode<synchronous>, transform_indices = @transform_8, window_bounds = array<i64: 128, 128>}, {pipeline_mode = #tpu.pipeline_mode<synchronous>, transform_indices = @transform_9, window_bounds = array<i64: 1, 128>}, {transform_indices = @transform_10, window_bounds = array<i64: 8, 128>}]} {
    %c0 = arith.constant 0 : index
    %c0_0 = arith.constant 0 : index
    %c0_1 = arith.constant 0 : index
    %0 = vector.load %arg1[%c0, %c0_0, %c0_1] : memref<16x8x15xbf16, #tpu.memory_space<vmem>>, vector<16x8x15xbf16>
    %1 = vector.shape_cast %0 : vector<16x8x15xbf16> to vector<128x15xbf16>
    %c0_2 = arith.constant 0 : index
    %c0_3 = arith.constant 0 : index
    %2 = vector.load %arg2[%c0_2, %c0_3] : memref<15x16xbf16, #tpu.memory_space<vmem>>, vector<15x16xbf16>
    %cst = arith.constant dense<0.000000e+00> : vector<128x16xf32>
    %3 = tpu.matmul %1, %2, %cst {dimension_numbers = #tpu.dot_dimension_numbers<[1], [0], [0], [1], [0, 0, 1, 1], [], []>} : vector<128x15xbf16>, vector<15x16xbf16>, vector<128x16xf32> -> vector<128x16xf32>
    %c0_4 = arith.constant 0 : index
    %c0_5 = arith.constant 0 : index
    %4 = vector.load %arg3[%c0_4, %c0_5] : memref<1x16xf32, #tpu.memory_space<vmem>>, vector<1x16xf32>
    %5 = vector.broadcast %4 : vector<1x16xf32> to vector<128x16xf32>
    %6 = arith.addf %3, %5 : vector<128x16xf32>
    %cst_6 = arith.constant 0.000000e+00 : f32
    %7 = vector.broadcast %cst_6 : f32 to vector<128x16xf32>
    %8 = arith.maximumf %6, %7 : vector<128x16xf32>
    %9 = vector.shape_cast %8 : vector<128x16xf32> to vector<16x8x16xf32>
    %10 = vector.shape_cast %9 : vector<16x8x16xf32> to vector<8x2x8x16xf32>
    %11 = vector.extract_strided_slice %10 {offsets = [0, 0, 0, 0], sizes = [8, 1, 8, 16], strides = [1, 1, 1, 1]} : vector<8x2x8x16xf32> to vector<8x1x8x16xf32>
    %12 = vector.shape_cast %11 : vector<8x1x8x16xf32> to vector<8x8x16xf32>
    %13 = vector.extract_strided_slice %10 {offsets = [0, 1, 0, 0], sizes = [8, 1, 8, 16], strides = [1, 1, 1, 1]} : vector<8x2x8x16xf32> to vector<8x1x8x16xf32>
    %14 = vector.shape_cast %13 : vector<8x1x8x16xf32> to vector<8x8x16xf32>
    %15 = arith.maximumf %12, %14 : vector<8x8x16xf32>
    %cst_7 = arith.constant 0.000000e+00 : f32
    %16 = vector.broadcast %cst_7 : f32 to vector<1x8x16xf32>
    %17 = tpu.concatenate %16, %15, %16 in 0 : vector<1x8x16xf32>, vector<8x8x16xf32>, vector<1x8x16xf32> -> vector<10x8x16xf32>
    %18 = vector.extract_strided_slice %17 {offsets = [0, 0, 0], sizes = [8, 8, 16], strides = [1, 1, 1]} : vector<10x8x16xf32> to vector<8x8x16xf32>
    %19 = vector.extract_strided_slice %17 {offsets = [1, 0, 0], sizes = [8, 8, 16], strides = [1, 1, 1]} : vector<10x8x16xf32> to vector<8x8x16xf32>
    %20 = vector.extract_strided_slice %17 {offsets = [2, 0, 0], sizes = [8, 8, 16], strides = [1, 1, 1]} : vector<10x8x16xf32> to vector<8x8x16xf32>
    %21 = tpu.concatenate %18, %19, %20 in 2 : vector<8x8x16xf32>, vector<8x8x16xf32>, vector<8x8x16xf32> -> vector<8x8x48xf32>
    %22 = vector.shape_cast %21 : vector<8x8x48xf32> to vector<64x48xf32>
    %23 = arith.truncf %22 : vector<64x48xf32> to vector<64x48xbf16>
    %c0_8 = arith.constant 0 : index
    %c0_9 = arith.constant 0 : index
    %24 = vector.load %arg4[%c0_8, %c0_9] : memref<48x32xbf16, #tpu.memory_space<vmem>>, vector<48x32xbf16>
    %cst_10 = arith.constant dense<0.000000e+00> : vector<64x32xf32>
    %25 = tpu.matmul %23, %24, %cst_10 {dimension_numbers = #tpu.dot_dimension_numbers<[1], [0], [0], [1], [0, 0, 1, 1], [], []>} : vector<64x48xbf16>, vector<48x32xbf16>, vector<64x32xf32> -> vector<64x32xf32>
    %c0_11 = arith.constant 0 : index
    %c0_12 = arith.constant 0 : index
    %26 = vector.load %arg5[%c0_11, %c0_12] : memref<1x32xf32, #tpu.memory_space<vmem>>, vector<1x32xf32>
    %27 = vector.broadcast %26 : vector<1x32xf32> to vector<64x32xf32>
    %28 = arith.addf %25, %27 : vector<64x32xf32>
    %cst_13 = arith.constant 0.000000e+00 : f32
    %29 = vector.broadcast %cst_13 : f32 to vector<64x32xf32>
    %30 = arith.maximumf %28, %29 : vector<64x32xf32>
    %31 = vector.shape_cast %30 : vector<64x32xf32> to vector<8x8x32xf32>
    %32 = vector.shape_cast %31 : vector<8x8x32xf32> to vector<4x2x8x32xf32>
    %33 = vector.extract_strided_slice %32 {offsets = [0, 0, 0, 0], sizes = [4, 1, 8, 32], strides = [1, 1, 1, 1]} : vector<4x2x8x32xf32> to vector<4x1x8x32xf32>
    %34 = vector.shape_cast %33 : vector<4x1x8x32xf32> to vector<4x8x32xf32>
    %35 = vector.extract_strided_slice %32 {offsets = [0, 1, 0, 0], sizes = [4, 1, 8, 32], strides = [1, 1, 1, 1]} : vector<4x2x8x32xf32> to vector<4x1x8x32xf32>
    %36 = vector.shape_cast %35 : vector<4x1x8x32xf32> to vector<4x8x32xf32>
    %37 = arith.maximumf %34, %36 : vector<4x8x32xf32>
    %38 = vector.shape_cast %37 : vector<4x8x32xf32> to vector<32x32xf32>
    %39 = arith.truncf %38 : vector<32x32xf32> to vector<32x32xbf16>
    %c0_14 = arith.constant 0 : index
    %c0_15 = arith.constant 0 : index
    %40 = vector.load %arg6[%c0_14, %c0_15] : memref<32x512xbf16, #tpu.memory_space<vmem>>, vector<32x512xbf16>
    %cst_16 = arith.constant dense<0.000000e+00> : vector<32x512xf32>
    %41 = tpu.matmul %39, %40, %cst_16 {dimension_numbers = #tpu.dot_dimension_numbers<[1], [0], [0], [1], [0, 0, 1, 1], [], []>} : vector<32x32xbf16>, vector<32x512xbf16>, vector<32x512xf32> -> vector<32x512xf32>
    %c0_17 = arith.constant 0 : index
    %c0_18 = arith.constant 0 : index
    %42 = vector.load %arg8[%c0_17, %c0_18] : memref<1x512xf32, #tpu.memory_space<vmem>>, vector<1x512xf32>
    %43 = vector.broadcast %42 : vector<1x512xf32> to vector<32x512xf32>
    %44 = arith.addf %41, %43 : vector<32x512xf32>
    %45 = vector.shape_cast %44 : vector<32x512xf32> to vector<4x8x512xf32>
    %c0_19 = arith.constant 0 : index
    %c0_20 = arith.constant 0 : index
    %46 = vector.load %arg7[%c0_19, %c0_20] : memref<128x512xbf16, #tpu.memory_space<vmem>>, vector<128x512xbf16>
    %cst_21 = arith.constant 0.000000e+00 : f32
    %47 = vector.broadcast %cst_21 : f32 to vector<8x128xf32>
    %cst_22 = arith.constant 0.000000e+00 : f32
    %48 = vector.broadcast %cst_22 : f32 to vector<8x128xf32>
    %49 = vector.extract_strided_slice %45 {offsets = [0, 0, 0], sizes = [1, 8, 512], strides = [1, 1, 1]} : vector<4x8x512xf32> to vector<1x8x512xf32>
    %50 = vector.shape_cast %49 : vector<1x8x512xf32> to vector<8x512xf32>
    %51 = arith.truncf %47 : vector<8x128xf32> to vector<8x128xbf16>
    %cst_23 = arith.constant dense<0.000000e+00> : vector<8x512xf32>
    %52 = tpu.matmul %51, %46, %cst_23 {dimension_numbers = #tpu.dot_dimension_numbers<[1], [0], [0], [1], [0, 0, 1, 1], [], []>} : vector<8x128xbf16>, vector<128x512xbf16>, vector<8x512xf32> -> vector<8x512xf32>
    %53 = arith.addf %50, %52 : vector<8x512xf32>
    %54 = vector.extract_strided_slice %53 {offsets = [0, 0], sizes = [8, 128], strides = [1, 1]} : vector<8x512xf32> to vector<8x128xf32>
    %55 = arith.negf %54 : vector<8x128xf32>
    %56 = math.exp %55 : vector<8x128xf32>
    %cst_24 = arith.constant 1.000000e+00 : f32
    %57 = vector.broadcast %cst_24 : f32 to vector<8x128xf32>
    %58 = arith.addf %57, %56 : vector<8x128xf32>
    %59 = arith.divf %57, %58 : vector<8x128xf32>
    %60 = vector.extract_strided_slice %53 {offsets = [0, 128], sizes = [8, 128], strides = [1, 1]} : vector<8x512xf32> to vector<8x128xf32>
    %61 = arith.negf %60 : vector<8x128xf32>
    %62 = math.exp %61 : vector<8x128xf32>
    %cst_25 = arith.constant 1.000000e+00 : f32
    %63 = vector.broadcast %cst_25 : f32 to vector<8x128xf32>
    %64 = arith.addf %63, %62 : vector<8x128xf32>
    %65 = arith.divf %63, %64 : vector<8x128xf32>
    %66 = vector.extract_strided_slice %53 {offsets = [0, 256], sizes = [8, 128], strides = [1, 1]} : vector<8x512xf32> to vector<8x128xf32>
    %67 = math.tanh %66 : vector<8x128xf32>
    %68 = vector.extract_strided_slice %53 {offsets = [0, 384], sizes = [8, 128], strides = [1, 1]} : vector<8x512xf32> to vector<8x128xf32>
    %69 = arith.negf %68 : vector<8x128xf32>
    %70 = math.exp %69 : vector<8x128xf32>
    %cst_26 = arith.constant 1.000000e+00 : f32
    %71 = vector.broadcast %cst_26 : f32 to vector<8x128xf32>
    %72 = arith.addf %71, %70 : vector<8x128xf32>
    %73 = arith.divf %71, %72 : vector<8x128xf32>
    %74 = arith.mulf %65, %48 : vector<8x128xf32>
    %75 = arith.mulf %59, %67 : vector<8x128xf32>
    %76 = arith.addf %74, %75 : vector<8x128xf32>
    %77 = math.tanh %76 : vector<8x128xf32>
    %78 = arith.mulf %73, %77 : vector<8x128xf32>
    %79 = vector.extract_strided_slice %45 {offsets = [1, 0, 0], sizes = [1, 8, 512], strides = [1, 1, 1]} : vector<4x8x512xf32> to vector<1x8x512xf32>
    %80 = vector.shape_cast %79 : vector<1x8x512xf32> to vector<8x512xf32>
    %81 = arith.truncf %78 : vector<8x128xf32> to vector<8x128xbf16>
    %cst_27 = arith.constant dense<0.000000e+00> : vector<8x512xf32>
    %82 = tpu.matmul %81, %46, %cst_27 {dimension_numbers = #tpu.dot_dimension_numbers<[1], [0], [0], [1], [0, 0, 1, 1], [], []>} : vector<8x128xbf16>, vector<128x512xbf16>, vector<8x512xf32> -> vector<8x512xf32>
    %83 = arith.addf %80, %82 : vector<8x512xf32>
    %84 = vector.extract_strided_slice %83 {offsets = [0, 0], sizes = [8, 128], strides = [1, 1]} : vector<8x512xf32> to vector<8x128xf32>
    %85 = arith.negf %84 : vector<8x128xf32>
    %86 = math.exp %85 : vector<8x128xf32>
    %cst_28 = arith.constant 1.000000e+00 : f32
    %87 = vector.broadcast %cst_28 : f32 to vector<8x128xf32>
    %88 = arith.addf %87, %86 : vector<8x128xf32>
    %89 = arith.divf %87, %88 : vector<8x128xf32>
    %90 = vector.extract_strided_slice %83 {offsets = [0, 128], sizes = [8, 128], strides = [1, 1]} : vector<8x512xf32> to vector<8x128xf32>
    %91 = arith.negf %90 : vector<8x128xf32>
    %92 = math.exp %91 : vector<8x128xf32>
    %cst_29 = arith.constant 1.000000e+00 : f32
    %93 = vector.broadcast %cst_29 : f32 to vector<8x128xf32>
    %94 = arith.addf %93, %92 : vector<8x128xf32>
    %95 = arith.divf %93, %94 : vector<8x128xf32>
    %96 = vector.extract_strided_slice %83 {offsets = [0, 256], sizes = [8, 128], strides = [1, 1]} : vector<8x512xf32> to vector<8x128xf32>
    %97 = math.tanh %96 : vector<8x128xf32>
    %98 = vector.extract_strided_slice %83 {offsets = [0, 384], sizes = [8, 128], strides = [1, 1]} : vector<8x512xf32> to vector<8x128xf32>
    %99 = arith.negf %98 : vector<8x128xf32>
    %100 = math.exp %99 : vector<8x128xf32>
    %cst_30 = arith.constant 1.000000e+00 : f32
    %101 = vector.broadcast %cst_30 : f32 to vector<8x128xf32>
    %102 = arith.addf %101, %100 : vector<8x128xf32>
    %103 = arith.divf %101, %102 : vector<8x128xf32>
    %104 = arith.mulf %95, %76 : vector<8x128xf32>
    %105 = arith.mulf %89, %97 : vector<8x128xf32>
    %106 = arith.addf %104, %105 : vector<8x128xf32>
    %107 = math.tanh %106 : vector<8x128xf32>
    %108 = arith.mulf %103, %107 : vector<8x128xf32>
    %109 = vector.extract_strided_slice %45 {offsets = [2, 0, 0], sizes = [1, 8, 512], strides = [1, 1, 1]} : vector<4x8x512xf32> to vector<1x8x512xf32>
    %110 = vector.shape_cast %109 : vector<1x8x512xf32> to vector<8x512xf32>
    %111 = arith.truncf %108 : vector<8x128xf32> to vector<8x128xbf16>
    %cst_31 = arith.constant dense<0.000000e+00> : vector<8x512xf32>
    %112 = tpu.matmul %111, %46, %cst_31 {dimension_numbers = #tpu.dot_dimension_numbers<[1], [0], [0], [1], [0, 0, 1, 1], [], []>} : vector<8x128xbf16>, vector<128x512xbf16>, vector<8x512xf32> -> vector<8x512xf32>
    %113 = arith.addf %110, %112 : vector<8x512xf32>
    %114 = vector.extract_strided_slice %113 {offsets = [0, 0], sizes = [8, 128], strides = [1, 1]} : vector<8x512xf32> to vector<8x128xf32>
    %115 = arith.negf %114 : vector<8x128xf32>
    %116 = math.exp %115 : vector<8x128xf32>
    %cst_32 = arith.constant 1.000000e+00 : f32
    %117 = vector.broadcast %cst_32 : f32 to vector<8x128xf32>
    %118 = arith.addf %117, %116 : vector<8x128xf32>
    %119 = arith.divf %117, %118 : vector<8x128xf32>
    %120 = vector.extract_strided_slice %113 {offsets = [0, 128], sizes = [8, 128], strides = [1, 1]} : vector<8x512xf32> to vector<8x128xf32>
    %121 = arith.negf %120 : vector<8x128xf32>
    %122 = math.exp %121 : vector<8x128xf32>
    %cst_33 = arith.constant 1.000000e+00 : f32
    %123 = vector.broadcast %cst_33 : f32 to vector<8x128xf32>
    %124 = arith.addf %123, %122 : vector<8x128xf32>
    %125 = arith.divf %123, %124 : vector<8x128xf32>
    %126 = vector.extract_strided_slice %113 {offsets = [0, 256], sizes = [8, 128], strides = [1, 1]} : vector<8x512xf32> to vector<8x128xf32>
    %127 = math.tanh %126 : vector<8x128xf32>
    %128 = vector.extract_strided_slice %113 {offsets = [0, 384], sizes = [8, 128], strides = [1, 1]} : vector<8x512xf32> to vector<8x128xf32>
    %129 = arith.negf %128 : vector<8x128xf32>
    %130 = math.exp %129 : vector<8x128xf32>
    %cst_34 = arith.constant 1.000000e+00 : f32
    %131 = vector.broadcast %cst_34 : f32 to vector<8x128xf32>
    %132 = arith.addf %131, %130 : vector<8x128xf32>
    %133 = arith.divf %131, %132 : vector<8x128xf32>
    %134 = arith.mulf %125, %106 : vector<8x128xf32>
    %135 = arith.mulf %119, %127 : vector<8x128xf32>
    %136 = arith.addf %134, %135 : vector<8x128xf32>
    %137 = math.tanh %136 : vector<8x128xf32>
    %138 = arith.mulf %133, %137 : vector<8x128xf32>
    %139 = vector.extract_strided_slice %45 {offsets = [3, 0, 0], sizes = [1, 8, 512], strides = [1, 1, 1]} : vector<4x8x512xf32> to vector<1x8x512xf32>
    %140 = vector.shape_cast %139 : vector<1x8x512xf32> to vector<8x512xf32>
    %141 = arith.truncf %138 : vector<8x128xf32> to vector<8x128xbf16>
    %cst_35 = arith.constant dense<0.000000e+00> : vector<8x512xf32>
    %142 = tpu.matmul %141, %46, %cst_35 {dimension_numbers = #tpu.dot_dimension_numbers<[1], [0], [0], [1], [0, 0, 1, 1], [], []>} : vector<8x128xbf16>, vector<128x512xbf16>, vector<8x512xf32> -> vector<8x512xf32>
    %143 = arith.addf %140, %142 : vector<8x512xf32>
    %144 = vector.extract_strided_slice %143 {offsets = [0, 0], sizes = [8, 128], strides = [1, 1]} : vector<8x512xf32> to vector<8x128xf32>
    %145 = arith.negf %144 : vector<8x128xf32>
    %146 = math.exp %145 : vector<8x128xf32>
    %cst_36 = arith.constant 1.000000e+00 : f32
    %147 = vector.broadcast %cst_36 : f32 to vector<8x128xf32>
    %148 = arith.addf %147, %146 : vector<8x128xf32>
    %149 = arith.divf %147, %148 : vector<8x128xf32>
    %150 = vector.extract_strided_slice %143 {offsets = [0, 128], sizes = [8, 128], strides = [1, 1]} : vector<8x512xf32> to vector<8x128xf32>
    %151 = arith.negf %150 : vector<8x128xf32>
    %152 = math.exp %151 : vector<8x128xf32>
    %cst_37 = arith.constant 1.000000e+00 : f32
    %153 = vector.broadcast %cst_37 : f32 to vector<8x128xf32>
    %154 = arith.addf %153, %152 : vector<8x128xf32>
    %155 = arith.divf %153, %154 : vector<8x128xf32>
    %156 = vector.extract_strided_slice %143 {offsets = [0, 256], sizes = [8, 128], strides = [1, 1]} : vector<8x512xf32> to vector<8x128xf32>
    %157 = math.tanh %156 : vector<8x128xf32>
    %158 = vector.extract_strided_slice %143 {offsets = [0, 384], sizes = [8, 128], strides = [1, 1]} : vector<8x512xf32> to vector<8x128xf32>
    %159 = arith.negf %158 : vector<8x128xf32>
    %160 = math.exp %159 : vector<8x128xf32>
    %cst_38 = arith.constant 1.000000e+00 : f32
    %161 = vector.broadcast %cst_38 : f32 to vector<8x128xf32>
    %162 = arith.addf %161, %160 : vector<8x128xf32>
    %163 = arith.divf %161, %162 : vector<8x128xf32>
    %164 = arith.mulf %155, %136 : vector<8x128xf32>
    %165 = arith.mulf %149, %157 : vector<8x128xf32>
    %166 = arith.addf %164, %165 : vector<8x128xf32>
    %167 = math.tanh %166 : vector<8x128xf32>
    %168 = arith.mulf %163, %167 : vector<8x128xf32>
    %169 = arith.truncf %168 : vector<8x128xf32> to vector<8x128xbf16>
    %c0_39 = arith.constant 0 : index
    %c0_40 = arith.constant 0 : index
    %170 = vector.load %arg9[%c0_39, %c0_40] : memref<128x128xbf16, #tpu.memory_space<vmem>>, vector<128x128xbf16>
    %cst_41 = arith.constant dense<0.000000e+00> : vector<8x128xf32>
    %171 = tpu.matmul %169, %170, %cst_41 {dimension_numbers = #tpu.dot_dimension_numbers<[1], [0], [0], [1], [0, 0, 1, 1], [], []>} : vector<8x128xbf16>, vector<128x128xbf16>, vector<8x128xf32> -> vector<8x128xf32>
    %c0_42 = arith.constant 0 : index
    %c0_43 = arith.constant 0 : index
    %172 = vector.load %arg10[%c0_42, %c0_43] : memref<1x128xf32, #tpu.memory_space<vmem>>, vector<1x128xf32>
    %173 = vector.broadcast %172 : vector<1x128xf32> to vector<8x128xf32>
    %174 = arith.addf %171, %173 : vector<8x128xf32>
    %c0_44 = arith.constant 0 : index
    %c0_45 = arith.constant 0 : index
    %175 = vector.load %arg11[%c0_44, %c0_45] : memref<8x128xf32, #tpu.memory_space<vmem>>, vector<8x128xf32>
    tpu.vector_store %arg11[%c0_44, %c0_45], %174 {strides = array<i32>} : memref<8x128xf32, #tpu.memory_space<vmem>>, vector<8x128xf32>,
    return
  }
  func.func @transform_0(%arg0: i32) -> (i32, i32, i32) {
    %c0_i32 = arith.constant 0 : i32
    %c0_i32_0 = arith.constant 0 : i32
    %c0_i32_1 = arith.constant 0 : i32
    return %c0_i32, %arg0, %c0_i32_0 : i32, i32, i32
  }
  func.func @transform_1(%arg0: i32) -> (i32, i32) {
    %c0_i32 = arith.constant 0 : i32
    %c0_i32_0 = arith.constant 0 : i32
    %c0_i32_1 = arith.constant 0 : i32
    return %c0_i32, %c0_i32_0 : i32, i32
  }
  func.func @transform_2(%arg0: i32) -> (i32, i32) {
    %c0_i32 = arith.constant 0 : i32
    %c0_i32_0 = arith.constant 0 : i32
    %c0_i32_1 = arith.constant 0 : i32
    return %c0_i32, %c0_i32_0 : i32, i32
  }
  func.func @transform_3(%arg0: i32) -> (i32, i32) {
    %c0_i32 = arith.constant 0 : i32
    %c0_i32_0 = arith.constant 0 : i32
    %c0_i32_1 = arith.constant 0 : i32
    return %c0_i32, %c0_i32_0 : i32, i32
  }
  func.func @transform_4(%arg0: i32) -> (i32, i32) {
    %c0_i32 = arith.constant 0 : i32
    %c0_i32_0 = arith.constant 0 : i32
    %c0_i32_1 = arith.constant 0 : i32
    return %c0_i32, %c0_i32_0 : i32, i32
  }
  func.func @transform_5(%arg0: i32) -> (i32, i32) {
    %c0_i32 = arith.constant 0 : i32
    %c0_i32_0 = arith.constant 0 : i32
    %c0_i32_1 = arith.constant 0 : i32
    return %c0_i32, %c0_i32_0 : i32, i32
  }
  func.func @transform_6(%arg0: i32) -> (i32, i32) {
    %c0_i32 = arith.constant 0 : i32
    %c0_i32_0 = arith.constant 0 : i32
    %c0_i32_1 = arith.constant 0 : i32
    return %c0_i32, %c0_i32_0 : i32, i32
  }
  func.func @transform_7(%arg0: i32) -> (i32, i32) {
    %c0_i32 = arith.constant 0 : i32
    %c0_i32_0 = arith.constant 0 : i32
    %c0_i32_1 = arith.constant 0 : i32
    return %c0_i32, %c0_i32_0 : i32, i32
  }
  func.func @transform_8(%arg0: i32) -> (i32, i32) {
    %c0_i32 = arith.constant 0 : i32
    %c0_i32_0 = arith.constant 0 : i32
    %c0_i32_1 = arith.constant 0 : i32
    return %c0_i32, %c0_i32_0 : i32, i32
  }
  func.func @transform_9(%arg0: i32) -> (i32, i32) {
    %c0_i32 = arith.constant 0 : i32
    %c0_i32_0 = arith.constant 0 : i32
    %c0_i32_1 = arith.constant 0 : i32
    return %c0_i32, %c0_i32_0 : i32, i32
  }
  func.func @transform_10(%arg0: i32) -> (i32, i32) {
    %c0_i32 = arith.constant 0 : i32
    %c0_i32_0 = arith.constant 0 : i32
    return %arg0, %c0_i32 : i32, i32
  }
}

</mosaic_0001>

<bundles_post_ra>
// kernel: cnn_lstm_forward.1
= control target key start
LH: loop header
LB: loop body
LE: loop exit
PB: predicated region body
PF: predicated region fallthrough
CT: control target
= control target key end

     0   :  { %s3148_s0 = inlined_call_operand.vmem [shape: bf16[16,16,15], index: 0, kind: input, shape index: {}]   ;;  %s3149_s1 = inlined_call_operand.vmem [shape: bf16[15,16], index: 1, kind: input, shape index: {}]   ;;  %s3150_s2 = inlined_call_operand.vmem [shape: f32[1,16], index: 2, kind: input, shape index: {}]   ;;  %s3151_s3 = inlined_call_operand.vmem [shape: bf16[48,32], index: 3, kind: input, shape index: {}]   ;;  %s3152_s4 = inlined_call_operand.vmem [shape: f32[1,32], index: 4, kind: input, shape index: {}]   ;;  %s3153_s5 = inlined_call_operand.vmem [shape: bf16[32,512], index: 5, kind: input, shape index: {}]   ;;  %s3154_s6 = inlined_call_operand.vmem [shape: bf16[128,512], index: 6, kind: input, shape index: {}]   ;;  %s3155_s7 = inlined_call_operand.vmem [shape: f32[1,512], index: 7, kind: input, shape index: {}]   ;;  %s3156_s8 = inlined_call_operand.vmem [shape: bf16[128,128], index: 8, kind: input, shape index: {}]   ;;  %s3157_s9 = inlined_call_operand.vmem [shape: f32[1,128], index: 9, kind: input, shape index: {}]   ;;  %s3158_s10 = inlined_call_operand.hbm [shape: f32[16,128], index: 10, kind: output, shape index: {}]  }
   0x1   :  { %3159 = sst [smem:[#allocation11_spill]] %s3148_s0 }
   0x2   :  { %3160 = sst [smem:[#allocation12_spill]] %s3149_s1 }
   0x3   :  { %15 = vsyncpa [#allocation4], 0 }
   0x4   :  { %17 = vsyncpa [#allocation4 + $0x1], 0  ;;  %s2390_s13 = smov 0   ;;  %s2392_s14 = smov 0  }
   0x5   :  { %s2394_s15 = smov 0   ;;  %s2396_s16 = smov 0  }
   0x6 LB: > { %s1771_s17 = sadd.s32 4294967295, %s2329_s16   ;;  %s1772_s18 = sadd.s32 4294967294, %s2329_s16   ;;  %s2329_s16 = sphi %s2396_s16, %s3178_s16   ;;  %s2325_s15 = sphi %s2394_s15, %s3177_s15   ;;  %s2321_s14 = sphi %s2392_s14, %s3176_s14   ;;  %s2317_s13 = sphi %s2390_s13, %s3175_s13  }
   0x7   : > { %s2413_s19 = sadd.s32 1, %s2329_s16   ;;  %s30_s20 = sadd.s32 1, %s2325_s15 }
   0x8   : > { %s27_s21 = ssub.s32 %s2329_s16, %s2413_s19  ;;  %p37_p0 = scmp.ne.s32.totalorder %s2325_s15, %s2321_s14 }
   0x9   : > { %p28_p1 = scmp.eq.s32.totalorder %s27_s21, 0  ;;  %p38_p2 = scmp.eq.s32.totalorder %s2329_s16, 0 }
   0xa   : > { %p256_p3 = scmp.eq.s32.totalorder %s1771_s17, 1  ;;  %p261_p4 = scmp.ne.s32.totalorder %s2321_s14, %s2317_s13 }
   0xb   : > { %s2426_s22 = scalar_select %p28_p1, %s2325_s15, %s30_s20  }
   0xc   : > { %p39_p5 = por %p38_p2, %p37_p0  ;;  %p2428_p6 = por %p256_p3, %p37_p0 }
   0xd   : > { %p262_p7 = scmp.eq.s32.totalorder %s1772_s18, 1  ;;  %p1774_p9 = scmp.ge.s32.totalorder %s2329_s16, 2 }
   0xf   : > { %p2432_p8 = por %p262_p7, %p261_p4  ;;  %305 = sbr.rel (%p1774_p9) target bundleno = 46 (0x2e), region = 52 }
  0x14   : > { %308 = sbr.rel (!%p39_p5) target bundleno = 46 (0x2e), region = 56  ;;  %s310_s25 = sand.u32 (%p39_p5), 1, %s2325_s15  }
  0x15   : > { %s1776_s26 = sshll.u32 (%p39_p5), %s2329_s16, 2  ;;  %s1775_s27 = sshll.u32 (%p39_p5), %s310_s25, 6 }
  0x16   : > { %s3163_s0 = sld [smem:[#allocation11_spill]] (%p39_p5)  ;;  %s312_s11 = scalar_lea.vmem (%p39_p5), [#allocation2], %s1775_s27 }
  0x1c   : > { %s2444_s30 = scalar_lea.vmem %s3163_s0, %s1776_s26 }
  0x1d   : > { %v331_v0 = vld [vmem:[%s2444_s30] sm:$0xf]  ;;  %v333_v1 = vld [vmem:[%s2444_s30 + $0x8] sm:$0xf]  ;;  %v335_v2 = vld [vmem:[%s2444_s30 + $0x10] sm:$0xf] }
  0x1e   : > { %332 = vst [vmem:[%s312_s11] sm:$0xf] %v331_v0  ;;  %v337_v3 = vld [vmem:[%s2444_s30 + $0x18] sm:$0xf]  ;;  %v339_v4 = vld [vmem:[%s2444_s30 + $0x20] sm:$0xf] }
  0x1f   : > { %334 = vst [vmem:[%s312_s11 + $0x4] sm:$0xf] %v333_v1  ;;  %v341_v5 = vld [vmem:[%s2444_s30 + $0x28] sm:$0xf]  ;;  %v343_v6 = vld [vmem:[%s2444_s30 + $0x30] sm:$0xf] }
  0x20   : > { %336 = vst [vmem:[%s312_s11 + $0x8] sm:$0xf] %v335_v2  ;;  %v345_v7 = vld [vmem:[%s2444_s30 + $0x38] sm:$0xf]  ;;  %v347_v8 = vld [vmem:[%s2444_s30 + $0x40] sm:$0xf] }
  0x21   : > { %338 = vst [vmem:[%s312_s11 + $0xc] sm:$0xf] %v337_v3  ;;  %v349_v9 = vld [vmem:[%s2444_s30 + $0x48] sm:$0xf]  ;;  %v351_v10 = vld [vmem:[%s2444_s30 + $0x50] sm:$0xf] }
  0x22   : > { %340 = vst [vmem:[%s312_s11 + $0x10] sm:$0xf] %v339_v4  ;;  %v353_v11 = vld [vmem:[%s2444_s30 + $0x58] sm:$0xf]  ;;  %v355_v12 = vld [vmem:[%s2444_s30 + $0x60] sm:$0xf] }
  0x23   : > { %342 = vst [vmem:[%s312_s11 + $0x14] sm:$0xf] %v341_v5  ;;  %v357_v13 = vld [vmem:[%s2444_s30 + $0x68] sm:$0xf]  ;;  %v359_v14 = vld [vmem:[%s2444_s30 + $0x70] sm:$0xf] }
  0x24   : > { %344 = vst [vmem:[%s312_s11 + $0x18] sm:$0xf] %v343_v6  ;;  %v361_v15 = vld [vmem:[%s2444_s30 + $0x78] sm:$0xf] }
  0x25   : > { %346 = vst [vmem:[%s312_s11 + $0x1c] sm:$0xf] %v345_v7 }
  0x26   : > { %348 = vst [vmem:[%s312_s11 + $0x20] sm:$0xf] %v347_v8 }
  0x27   : > { %350 = vst [vmem:[%s312_s11 + $0x24] sm:$0xf] %v349_v9 }
  0x28   : > { %352 = vst [vmem:[%s312_s11 + $0x28] sm:$0xf] %v351_v10 }
  0x29   : > { %354 = vst [vmem:[%s312_s11 + $0x2c] sm:$0xf] %v353_v11 }
  0x2a   : > { %356 = vst [vmem:[%s312_s11 + $0x30] sm:$0xf] %v355_v12 }
  0x2b   : > { %358 = vst [vmem:[%s312_s11 + $0x34] sm:$0xf] %v357_v13 }
  0x2c   : > { %360 = vst [vmem:[%s312_s11 + $0x38] sm:$0xf] %v359_v14 }
  0x2d   : > { %362 = vst [vmem:[%s312_s11 + $0x3c] sm:$0xf] %v361_v15 }
  0x2e PF: > { %p1777_p10 = scmp.ge.s32.totalorder %s2329_s16, 1  ;;  %p417_p11 = scmp.lt.s32.totalorder %s2329_s16, 3 }
  0x30   : > { %p418_p12 = pnand %p1777_p10, %p417_p11 }
  0x32   : > { %421 = sbr.rel (%p418_p12) target bundleno = 1485 (0x5cd), region = 97 }
  0x37   : > { %s3164_s1 = sld [smem:[#allocation12_spill]]  ;;  %vm554_vm0 = vcmask 1046528   ;;  %vm555_vm1 = vcmask 1047552   ;;  %s2468_s20 = sand.u32 1, %s2321_s14   ;;  %v2331_v17 = vmov 65535   ;;  %vm529_vm2 = vcmask 121856  }
  0x38   : > { %v556_v18 = vsel %vm554_vm0, 4294967295, %v2331_v17  ;;  %s1778_s21 = sshll.u32 %s2468_s20, 6  ;;  %v2474_v32 = vld [vmem:[%s3150_s2] ss:$0 sm:$0xff]  ;;  %s2332_s28 = smov 16   ;;  %vm691_vm3 = vcmask 130048  }
  0x39   : > { %v557_v19 = vsel %vm555_vm1, %v556_v18, 0  ;;  %s426_s25 = scalar_lea.vmem [#allocation2], %s1778_s21  ;;  %s2333_s29 = smov 32   ;;  %vm700_vm4 = vcmask 261120   ;;  %vm741_vm5 = vcmask 392192  }
  0x3a   : > { %v2056_v21 = vld [vmem:[%s426_s25] sm:$0xff]  ;;  %v2057_v22 = vld [vmem:[%s426_s25 + $0x8] sm:$0xff]  ;;  %v2058_v23 = vld [vmem:[%s426_s25 + $0x10] sm:$0xff]  ;;  %s2053_s26 = sshll.u32 %s1771_s17, 3  ;;  %s1779_s27 = sshll.u32 %s2468_s20, 3 }
  0x3b   : > { %v2059_v24 = vld [vmem:[%s426_s25 + $0x18] sm:$0xff]  ;;  %v2060_v25 = vld [vmem:[%s426_s25 + $0x20] sm:$0xff]  ;;  %v2061_v26 = vld [vmem:[%s426_s25 + $0x28] sm:$0xff]  ;;  %s1702_s30 = scalar_lea.hbm %s3158_s10, %s2053_s26  ;;  %s460_s18 = scalar_lea.vmem [#allocation3], %s1779_s27 }
  0x3c   : > { %v2062_v27 = vld [vmem:[%s426_s25 + $0x30] sm:$0xff]  ;;  %v2063_v28 = vld [vmem:[%s426_s25 + $0x38] sm:$0xff]  ;;  %s1704_s21 = sshll.u32 %s460_s18, 4  ;;  %s1706_s25 = sshll.u32 %s1702_s30, 4  ;;  %s1705_s21 = int_to_ptr.vmem [resolvable:$true] %s1704_s21  ;;  %s1707_s25 = int_to_ptr.hbm [resolvable:$true] %s1706_s25 }
  0x3d   : > { %v2064_v16 = vld [vmem:[%s3164_s1] sm:$0xff]  ;;  %s1692_s0 = scalar_lea.sflag [#allocation4], %s2468_s20  ;;  %s2281_s17 = sshra.s32 %s1707_s25, 4  ;;  %s2282_s17 = int_to_ptr.hbm [resolvable:$true] %s2281_s17 }
  0x3e   : > { %v559_v20 = vand.u32 %v2064_v16, %v557_v19  ;;  %s2283_s1 = scalar_lea.hbm %s2282_s17, 8  ;;  %p2288_p2 = scmp.lt.s32.totalorder %s2282_s17, %s3158_s10 }
  0x3f   : > { %p2284_p13 = scmp.ne.s32.totalorder %s2282_s17, %s2283_s1 }
  0x40   : > { %568 = vmatpush.bf16.msra.mxu0 %v559_v20 }
  0x41   : > { %p2285_p0 = pnand %p2284_p13, %p2428_p6 }
  0x43   : > { %1816 = vmatmul.msk.bf16.vlgmr.msra.gmra.mxu0 %vm529_vm2, %v2056_v21  ;;  %p2286_p1 = pneg %p2285_p0 }
  0x53   : > { %1817 = vmatmul.msk.bf16.gmra.mxu0 %vm529_vm2, %v2057_v22  ;;  %v2067_v22 = vld [vmem:[%s3151_s3 + $0x10] sm:$0xff] }
  0x54   : > { %759 = vmatpush.bf16.msra.mxu1 %v2067_v22  ;;  %v2068_v22 = vld [vmem:[%s3153_s5 + $0x4] sm:$0xf] }
  0x63   : > { %1818 = vmatmul.msk.bf16.gmra.mxu0 %vm529_vm2, %v2058_v23 }
  0x73   : > { %1819 = vmatmul.msk.bf16.gmra.mxu0 %vm529_vm2, %v2059_v24 }
  0x83   : > { %1820 = vmatmul.msk.bf16.gmra.mxu0 %vm529_vm2, %v2060_v25  ;;  %v2066_v25 = vld [vmem:[%s3151_s3 + $0x8] sm:$0xff] }
  0x84   : > { %760 = vmatpush.bf16.msra.mxu1 %v2066_v25 }
  0x93   : > { %1821 = vmatmul.msk.bf16.gmra.mxu0 %vm529_vm2, %v2061_v26 }
  0xa3   : > { %1822 = vmatmul.msk.bf16.gmra.mxu0 %vm529_vm2, %v2062_v27 }
  0xb3   : > { %1823 = vmatmul.msk.bf16.gmra.mxu0 %vm529_vm2, %v2063_v28 }
  0xc0   : > { %v570_v29 = vpop.f32.mrf.mxu0 }
  0xc1   : > { %v571_v34 = vadd.f32 %v2474_v32, %v570_v29 }
  0xc3   : > { %v610_v39 = vmax.f32 %v571_v34, 0.0 }
  0xc8   : > { %v572_v30 = vpop.f32.mrf.mxu0 }
  0xc9   : > { %v573_v33 = vadd.f32 %v2474_v32, %v572_v30 }
  0xcb   : > { %v611_v37 = vmax.f32 %v573_v33, 0.0  ;;  %v2065_v33 = vld [vmem:[%s3151_s3] sm:$0xff] }
  0xcc   : > { %761 = vmatpush.bf16.msra.mxu1 %v2065_v33 }
  0xcd   : > { %v2480_v42 = vmax.f32 %v610_v39, %v611_v37 }
  0xd0   : > { %v575_v31 = vpop.f32.mrf.mxu0 }
  0xd1   : > { %v576_v35 = vadd.f32 %v2474_v32, %v575_v31 }
  0xd3   : > { %v612_v40 = vmax.f32 %v576_v35, 0.0 }
  0xd8   : > { %v577_v36 = vpop.f32.mrf.mxu0 }
  0xd9   : > { %v578_v38 = vadd.f32 %v2474_v32, %v577_v36 }
  0xdb   : > { %v613_v41 = vmax.f32 %v578_v38, 0.0 }
  0xdd   : > { %v2482_v43 = vmax.f32 %v612_v40, %v613_v41 }
  0xdf   : > { %v2160_v44 = vpack.i.bf16 %v2482_v43, %v2480_v42 }
  0xe0   : > { %v580_v45 = vpop.f32.mrf.mxu0 }
  0xe1   : > { %2161 = vrot.lane.b32.xlu0 %v2160_v44, %s2332_s28  ;;  %v581_v46 = vadd.f32 %v2474_v32, %v580_v45 }
  0xe3   : > { %v614_v49 = vmax.f32 %v581_v46, 0.0 }
  0xe8   : > { %v582_v47 = vpop.f32.mrf.mxu0 }
  0xe9   : > { %v583_v48 = vadd.f32 %v2474_v32, %v582_v47 }
  0xeb   : > { %v615_v50 = vmax.f32 %v583_v48, 0.0 }
  0xed   : > { %v2489_v51 = vmax.f32 %v614_v49, %v615_v50 }
  0xef   : > { %v2165_v52 = vpack.i.bf16 %v2489_v51, %v2482_v43 }
  0xf0   : > { %v585_v53 = vpop.f32.mrf.mxu0 }
  0xf1   : > { %2166 = vrot.lane.b32.xlu0 %v2165_v52, %s2333_s29  ;;  %v586_v54 = vadd.f32 %v2474_v32, %v585_v53 }
  0xf3   : > { %v616_v57 = vmax.f32 %v586_v54, 0.0 }
  0xf8   : > { %v587_v55 = vpop.f32.mrf.mxu0 }
  0xf9   : > { %v588_v56 = vadd.f32 %v2474_v32, %v587_v55 }
  0xfb   : > { %v617_v58 = vmax.f32 %v588_v56, 0.0 }
  0xfd   : > { %v2496_v59 = vmax.f32 %v616_v57, %v617_v58 }
  0xff   : > { %v2170_v60 = vpack.i.bf16 %v2496_v59, %v2489_v51 }
 0x100   : > { %v590_v61 = vpop.f32.mrf.mxu0 }
 0x101   : > { %2171 = vrot.lane.b32.xlu1 %v2170_v60, %s2332_s28  ;;  %v591_v62 = vadd.f32 %v2474_v32, %v590_v61 }
 0x103   : > { %v618_v1 = vmax.f32 %v591_v62, 0.0 }
 0x108   : > { %v592_v63 = vpop.f32.mrf.mxu0 }
 0x109   : > { %v593_v0 = vadd.f32 %v2474_v32, %v592_v63 }
 0x10b   : > { %v619_v2 = vmax.f32 %v593_v0, 0.0 }
 0x10d   : > { %v2503_v3 = vmax.f32 %v618_v1, %v619_v2 }
 0x10f   : > { %v2175_v4 = vpack.i.bf16 %v2503_v3, %v2496_v59 }
 0x110   : > { %v595_v5 = vpop.f32.mrf.mxu0 }
 0x111   : > { %2176 = vrot.lane.b32.xlu1 %v2175_v4, %s2333_s29  ;;  %v596_v6 = vadd.f32 %v2474_v32, %v595_v5 }
 0x113   : > { %v620_v9 = vmax.f32 %v596_v6, 0.0 }
 0x118   : > { %v597_v7 = vpop.f32.mrf.mxu0 }
 0x119   : > { %v598_v8 = vadd.f32 %v2474_v32, %v597_v7 }
 0x11b   : > { %v621_v10 = vmax.f32 %v598_v8, 0.0 }
 0x11d   : > { %v2510_v11 = vmax.f32 %v620_v9, %v621_v10 }
 0x11f   : > { %v2180_v12 = vpack.i.bf16 %v2510_v11, %v2503_v3 }
 0x120   : > { %v600_v13 = vpop.f32.mrf.mxu0 }
 0x121   : > { %2181 = vrot.lane.b32.xlu2 %v2180_v12, %s2332_s28  ;;  %v601_v14 = vadd.f32 %v2474_v32, %v600_v13 }
 0x123   : > { %v622_v17 = vmax.f32 %v601_v14, 0.0  ;;  %v1858_v14 = vld [vmem:[%s3153_s5 + $0x20] sm:$0xf] }
 0x128   : > { %v602_v15 = vpop.f32.mrf.mxu0 }
 0x129   : > { %v603_v16 = vadd.f32 %v2474_v32, %v602_v15  ;;  %v2074_v15 = vld [vmem:[%s3153_s5 + $0x2c] sm:$0xf0] }
 0x12b   : > { %v623_v18 = vmax.f32 %v603_v16, 0.0  ;;  %v2072_v16 = vld [vmem:[%s3153_s5 + $0x24] sm:$0xf] }
 0x12d   : > { %v2517_v19 = vmax.f32 %v622_v17, %v623_v18  ;;  %v1860_v17 = vld [vmem:[%s3153_s5 + $0x30] sm:$0xf0] }
 0x12e   : > { %v1863_v18 = vor.u32 %v2072_v16, %v1860_v17 }
 0x12f   : > { %v2185_v20 = vpack.i.bf16 %v2517_v19, %v2510_v11 }
 0x130   : > { %v605_v21 = vpop.f32.mrf.mxu0  ;;  %886 = vmatpush.bf16.msra.mxu3 %v1863_v18  ;;  %v1946_v18 = vld [vmem:[%s3154_s6 + $0x80] sm:$0xf] }
 0x131   : > { %2186 = vrot.lane.b32.xlu2 %v2185_v20, %s2333_s29  ;;  %v606_v23 = vadd.f32 %v2474_v32, %v605_v21  ;;  %v2070_v20 = vld [vmem:[%s3153_s5 + $0xc] sm:$0xf0] }
 0x133   : > { %v624_v27 = vmax.f32 %v606_v23, 0.0  ;;  %v1844_v23 = vld [vmem:[%s3153_s5 + $0x10] sm:$0xf0] }
 0x138   : > { %v607_v24 = vpop.f32.mrf.mxu0 }
 0x139   : > { %v608_v26 = vadd.f32 %v2474_v32, %v607_v24  ;;  %v1847_v24 = vor.u32 %v2068_v22, %v1844_v23  ;;  %v1996_v22 = vld [vmem:[%s3154_s6 + $0xf0] sm:$0xf0]  ;;  %v1906_v23 = vld [vmem:[%s3154_s6 + $0x28] sm:$0xf] }
 0x13b   : > { %v625_v28 = vmax.f32 %v608_v26, 0.0  ;;  %887 = vmatpush.bf16.msra.mxu3 %v1847_v24 }
 0x13d   : > { %v633_v29 = vmax.f32 %v624_v27, %v625_v28  ;;  %v2590_v28 = vld [vmem:[%s3152_s4] ss:$0 sm:$0xff] }
 0x13f   : > { %v2195_v30 = vpack.i.bf16 0.0, %v633_v29  ;;  %v2190_v31 = vpack.i.bf16 %v633_v29, %v2517_v19 }
 0x141   : > { %2196 = vrot.lane.b32.xlu1 %v2195_v30, %s2333_s29  ;;  %2191 = vrot.lane.b32.xlu0 %v2190_v31, %s2332_s28  ;;  %s2287_s29 = scalar_lea.hbm %s3158_s10, 16 }
 0x142   : > { %p2289_p3 = scmp.lt.s32.totalorder %s2287_s29, %s2283_s1 }
 0x144   : > { %p2290_p4 = por %p2289_p3, %p2288_p2 }
 0x146   : > { %p2291_p5 = pnand %p2290_p4, %p2286_p1 }
 0x153   : > { %v2162_v34 = vpop.permute.xlu0 %2161 }
 0x154   : > { %v2164_v35 = vunpack.i.h.bf16 %v2162_v34  ;;  %v2163_v36 = vunpack.i.l.bf16 %v2162_v34 }
 0x156   : > { %v693_v39 = vsel %vm691_vm3, %v2480_v42, %v2164_v35  ;;  %v692_v40 = vsel %vm691_vm3, 0.0, %v2163_v36 }
 0x163   : > { %v2167_v32 = vpop.permute.xlu0 %2166 }
 0x164   : > { %v2169_v37 = vunpack.i.h.bf16 %v2167_v32  ;;  %v2168_v38 = vunpack.i.l.bf16 %v2167_v32 }
 0x166   : > { %v701_v41 = vsel %vm700_vm4, %v692_v40, %v2168_v38  ;;  %v702_v44 = vsel %vm700_vm4, %v693_v39, %v2169_v37 }
 0x167   : > { %v709_v45 = vpack.c.bf16 %v702_v44, %v701_v41  ;;  %v1866_v41 = vld [vmem:[%s3153_s5 + $0x28] sm:$0xf]  ;;  %v2075_v44 = vld [vmem:[%s3153_s5 + $0x34] sm:$0xf0] }
 0x169   : > { %1836 = vmatmul.msk.bf16.vlgmr.msra.gmra.mxu1 %vm741_vm5, %v709_v45  ;;  %v2073_v45 = vld [vmem:[%s3153_s5 + $0x2c] sm:$0xf] }
 0x173   : > { %v2172_v46 = vpop.permute.xlu1 %2171 }
 0x174   : > { %v2174_v47 = vunpack.i.h.bf16 %v2172_v46  ;;  %v2173_v48 = vunpack.i.l.bf16 %v2172_v46  ;;  %v1867_v46 = vor.u32 %v2075_v44, %v1866_v41  ;;  %v2096_v41 = vld [vmem:[%s3154_s6 + $0xa4] sm:$0xf]  ;;  %v1964_v44 = vld [vmem:[%s3154_s6 + $0xb0] sm:$0xf0] }
 0x176   : > { %v695_v53 = vsel %vm691_vm3, %v2489_v51, %v2174_v47  ;;  %v694_v42 = vsel %vm691_vm3, %v2482_v43, %v2173_v48  ;;  %v1868_v47 = vld [vmem:[%s3153_s5 + $0x38] sm:$0xf0] }
 0x177   : > { %v1871_v48 = vor.u32 %v2073_v45, %v1868_v47  ;;  %v2784_v47 = vor.u32 %v2096_v41, %v1964_v44  ;;  %v2089_v44 = vld [vmem:[%s3154_s6 + $0x6c] sm:$0xf] }
 0x179   : > { %924 = vmatpush.bf16.msrb.mxu3 %v1871_v48  ;;  %v1898_v48 = vld [vmem:[%s3154_s6 + $0x20] sm:$0xf] }
 0x17b   : > { %v2182_v54 = vpop.permute.xlu2 %2181 }
 0x17c   : > { %v2184_v60 = vunpack.i.h.bf16 %v2182_v54  ;;  %v2183_v61 = vunpack.i.l.bf16 %v2182_v54 }
 0x17e   : > { %v697_v0 = vsel %vm691_vm3, %v2503_v3, %v2184_v60  ;;  %v696_v51 = vsel %vm691_vm3, %v2496_v59, %v2183_v61  ;;  %v1850_v60 = vld [vmem:[%s3153_s5 + $0x8] sm:$0xf]  ;;  %v2071_v61 = vld [vmem:[%s3153_s5 + $0x14] sm:$0xf0] }
 0x183   : > { %v2177_v49 = vpop.permute.xlu1 %2176 }
 0x184   : > { %v2179_v50 = vunpack.i.h.bf16 %v2177_v49  ;;  %v2178_v52 = vunpack.i.l.bf16 %v2177_v49  ;;  %v2002_v49 = vld [vmem:[%s3154_s6 + $0xe8] sm:$0xf] }
 0x186   : > { %v703_v55 = vsel %vm700_vm4, %v694_v42, %v2178_v52  ;;  %v704_v56 = vsel %vm700_vm4, %v695_v53, %v2179_v50  ;;  %v2107_v50 = vld [vmem:[%s3154_s6 + $0xf4] sm:$0xf0]  ;;  %v1986_v53 = vld [vmem:[%s3154_s6 + $0xc8] sm:$0xf] }
 0x187   : > { %v710_v57 = vpack.c.bf16 %v704_v56, %v703_v55  ;;  %v2620_v52 = vor.u32 %v2107_v50, %v2002_v49  ;;  %v2103_v42 = vld [vmem:[%s3154_s6 + $0xd4] sm:$0xf0]  ;;  %v1970_v56 = vld [vmem:[%s3154_s6 + $0xa8] sm:$0xf]  ;;  %v2082_v49 = vld [vmem:[%s3154_s6 + $0x2c] sm:$0xf0] }
 0x188   : > { %v2630_v54 = vor.u32 %v2103_v42, %v1986_v53  ;;  %v2092_v42 = vld [vmem:[%s3154_s6 + $0x84] sm:$0xf] }
 0x189   : > { %1837 = vmatmul.msk.bf16.gmra.mxu1 %vm741_vm5, %v710_v57  ;;  %1275 = vmatpush.bf16.msrb.mxu0 %v2620_v52  ;;  %v2099_v57 = vld [vmem:[%s3154_s6 + $0xb4] sm:$0xf0] }
 0x18a   : > { %1155 = vmatpush.bf16.msrb.mxu1 %v2620_v52 }
 0x18b   : > { %v2187_v58 = vpop.permute.xlu2 %2186 }
 0x18c   : > { %v2189_v62 = vunpack.i.h.bf16 %v2187_v58  ;;  %v2188_v63 = vunpack.i.l.bf16 %v2187_v58  ;;  %v2642_v58 = vor.u32 %v2099_v57, %v1970_v56  ;;  %v1948_v56 = vld [vmem:[%s3154_s6 + $0x90] sm:$0xf0] }
 0x18d   : > { %1276 = vmatpush.bf16.msrb.mxu0 %v2630_v54 }
 0x18e   : > { %v705_v43 = vsel %vm700_vm4, %v696_v51, %v2188_v63  ;;  %v706_v1 = vsel %vm700_vm4, %v697_v0, %v2189_v62  ;;  %1156 = vmatpush.bf16.msrb.mxu1 %v2630_v54  ;;  %v1994_v62 = vld [vmem:[%s3154_s6 + $0xe0] sm:$0xf]  ;;  %v1851_v63 = vor.u32 %v2071_v61, %v1850_v60  ;;  %v2106_v0 = vld [vmem:[%s3154_s6 + $0xec] sm:$0xf0]  ;;  %v2069_v51 = vld [vmem:[%s3153_s5 + $0xc] sm:$0xf]  ;;  %v2807_v61 = vor.u32 %v2082_v49, %v1898_v48 }
 0x18f   : > { %v711_v2 = vpack.c.bf16 %v706_v1, %v705_v43  ;;  %v1852_v43 = vld [vmem:[%s3153_s5 + $0x18] sm:$0xf0]  ;;  %v2664_v1 = vor.u32 %v2106_v0, %v1994_v62  ;;  %v2334_v62 = vmov 0   ;;  %v2085_v49 = vld [vmem:[%s3154_s6 + $0x4c] sm:$0xf] }
 0x191   : > { %1277 = vmatpush.bf16.msrb.mxu0 %v2642_v58 }
 0x192   : > { %1157 = vmatpush.bf16.msrb.mxu1 %v2642_v58 }
 0x199   : > { %1838 = vmatmul.msk.bf16.gmra.mxu1 %vm741_vm5, %v711_v2  ;;  %v1855_v2 = vor.u32 %v2069_v51, %v1852_v43 }
 0x19b   : > { %925 = vmatpush.bf16.msrb.mxu3 %v1855_v2 }
 0x1b3   : > { %v2197_v4 = vpop.permute.xlu1 %2196  ;;  %v2192_v5 = vpop.permute.xlu0 %2191 }
 0x1b4   : > { %v2199_v6 = vunpack.i.h.bf16 %v2197_v4  ;;  %v2198_v7 = vunpack.i.l.bf16 %v2197_v4  ;;  %v2194_v8 = vunpack.i.h.bf16 %v2192_v5  ;;  %v2193_v9 = vunpack.i.l.bf16 %v2192_v5  ;;  %v1954_v4 = vld [vmem:[%s3154_s6 + $0x88] sm:$0xf]  ;;  %v2095_v5 = vld [vmem:[%s3154_s6 + $0x94] sm:$0xf0] }
 0x1b6   : > { %v699_v10 = vsel %vm691_vm3, %v2517_v19, %v2194_v8  ;;  %v698_v3 = vsel %vm691_vm3, %v2510_v11, %v2193_v9  ;;  %v1859_v11 = vor.u32 %v2074_v15, %v1858_v14  ;;  %v1842_v19 = vld [vmem:[%s3153_s5] sm:$0xf]  ;;  %v2102_v8 = vld [vmem:[%s3154_s6 + $0xcc] sm:$0xf0]  ;;  %v1938_v9 = vld [vmem:[%s3154_s6 + $0x68] sm:$0xf] }
 0x1b7   : > { %v707_v59 = vsel %vm700_vm4, %v698_v3, %v2198_v7  ;;  %v708_v12 = vsel %vm700_vm4, %v699_v10, %v2199_v6  ;;  %v1843_v21 = vor.u32 %v2070_v20, %v1842_v19  ;;  %v1978_v6 = vld [vmem:[%s3154_s6 + $0xc0] sm:$0xf]  ;;  %v2675_v7 = vor.u32 %v2095_v5, %v1954_v4  ;;  %v2091_v10 = vld [vmem:[%s3154_s6 + $0x74] sm:$0xf0]  ;;  %v1922_v14 = vld [vmem:[%s3154_s6 + $0x48] sm:$0xf] }
 0x1b8   : > { %v712_v13 = vpack.c.bf16 %v708_v12, %v707_v59  ;;  %867 = vmatpush.bf16.msra.mxu2 %v1859_v11  ;;  %v2687_v3 = vor.u32 %v2102_v8, %v1978_v6  ;;  %v2690_v59 = vor.u32 %v2091_v10, %v1938_v9  ;;  %v1962_v12 = vld [vmem:[%s3154_s6 + $0xa0] sm:$0xf]  ;;  %v2087_v15 = vld [vmem:[%s3154_s6 + $0x54] sm:$0xf0]  ;;  %v2094_v19 = vld [vmem:[%s3154_s6 + $0x8c] sm:$0xf0] }
 0x1b9   : > { %1158 = vmatpush.bf16.msrb.mxu1 %v2675_v7  ;;  %1278 = vmatpush.bf16.msrb.mxu0 %v2675_v7  ;;  %v2709_v17 = vor.u32 %v2087_v15, %v1922_v14  ;;  %v2721_v20 = vor.u32 %v2094_v19, %v1946_v18  ;;  %v1882_v4 = vld [vmem:[%s3154_s6] sm:$0xf]  ;;  %v2078_v5 = vld [vmem:[%s3154_s6 + $0xc] sm:$0xf0]  ;;  %v2088_v9 = vld [vmem:[%s3154_s6 + $0x64] sm:$0xf] }
 0x1ba   : > { %1839 = vmatmul.msk.bf16.gmra.mxu1 %vm741_vm5, %v712_v13  ;;  %v2098_v13 = vld [vmem:[%s3154_s6 + $0xac] sm:$0xf0]  ;;  %v2825_v8 = vor.u32 %v2078_v5, %v1882_v4  ;;  %v1932_v10 = vld [vmem:[%s3154_s6 + $0x70] sm:$0xf0] }
 0x1bb   : > { %v2706_v11 = vor.u32 %v2098_v13, %v1962_v12  ;;  %v2833_v12 = vor.u32 %v2088_v9, %v1932_v10  ;;  %v2084_v13 = vld [vmem:[%s3154_s6 + $0x44] sm:$0xf]  ;;  %v1916_v14 = vld [vmem:[%s3154_s6 + $0x50] sm:$0xf0] }
 0x1bc   : > { %868 = vmatpush.bf16.msra.mxu2 %v1843_v21  ;;  %v2104_v21 = vld [vmem:[%s3154_s6 + $0xe4] sm:$0xf]  ;;  %v2849_v15 = vor.u32 %v2084_v13, %v1916_v14  ;;  %v1900_v18 = vld [vmem:[%s3154_s6 + $0x30] sm:$0xf0] }
 0x1bd   : > { %1159 = vmatpush.bf16.msrb.mxu1 %v2690_v59  ;;  %1279 = vmatpush.bf16.msrb.mxu0 %v2690_v59 }
 0x1c0   : > { %905 = vmatpush.bf16.msrb.mxu2 %v1867_v46 }
 0x1c1   : > { %1160 = vmatpush.bf16.msrb.mxu1 %v2709_v17  ;;  %1280 = vmatpush.bf16.msrb.mxu0 %v2709_v17 }
 0x1c4   : > { %906 = vmatpush.bf16.msrb.mxu2 %v1851_v63  ;;  %v2811_v63 = vor.u32 %v2092_v42, %v1948_v56  ;;  %v2081_v42 = vld [vmem:[%s3154_s6 + $0x2c] sm:$0xf]  ;;  %v1908_v56 = vld [vmem:[%s3154_s6 + $0x38] sm:$0xf0] }
 0x1e6   : > { %v763_v25 = vpop.f32.mrf.mxu1 }
 0x1e7   : > { %v764_v30 = vadd.f32 %v2590_v28, %v763_v25  ;;  %v2732_v25 = vor.u32 %v2104_v21, %v1996_v22  ;;  %v2076_v21 = vld [vmem:[%s3154_s6 + $0x4] sm:$0xf]  ;;  %v1884_v22 = vld [vmem:[%s3154_s6 + $0x10] sm:$0xf0] }
 0x1e9   : > { %v783_v36 = vmax.f32 %v764_v30, 0.0  ;;  %v2090_v30 = vld [vmem:[%s3154_s6 + $0x6c] sm:$0xf0] }
 0x1ee   : > { %v765_v26 = vpop.f32.mrf.mxu1 }
 0x1ef   : > { %v766_v29 = vadd.f32 %v2590_v28, %v765_v26  ;;  %v2083_v26 = vld [vmem:[%s3154_s6 + $0x34] sm:$0xf0] }
 0x1f1   : > { %v784_v34 = vmax.f32 %v766_v29, 0.0  ;;  %v1930_v29 = vld [vmem:[%s3154_s6 + $0x60] sm:$0xf] }
 0x1f3   : > { %v791_v38 = vmax.f32 %v783_v36, %v784_v34  ;;  %v1980_v34 = vld [vmem:[%s3154_s6 + $0xd0] sm:$0xf0]  ;;  %v2079_v36 = vld [vmem:[%s3154_s6 + $0x14] sm:$0xf0] }
 0x206   : > { %v768_v27 = vpop.f32.mrf.mxu1 }
 0x207   : > { %v769_v31 = vadd.f32 %v2590_v28, %v768_v27  ;;  %v2738_v27 = vor.u32 %v2083_v26, %v1906_v23  ;;  %v2871_v23 = vor.u32 %v2076_v21, %v1884_v22  ;;  %v2004_v26 = vld [vmem:[%s3154_s6 + $0xf8] sm:$0xf0] }
 0x209   : > { %v785_v32 = vmax.f32 %v769_v31, 0.0  ;;  %v2100_v31 = vld [vmem:[%s3154_s6 + $0xc4] sm:$0xf]  ;;  %1161 = vmatpush.bf16.msrb.mxu1 %v2738_v27  ;;  %1281 = vmatpush.bf16.msrb.mxu0 %v2738_v27 }
 0x20e   : > { %v770_v33 = vpop.f32.mrf.mxu1 }
 0x20f   : > { %v771_v35 = vadd.f32 %v2590_v28, %v770_v33  ;;  %v2750_v33 = vor.u32 %v2090_v30, %v1930_v29  ;;  %v2101_v30 = vld [vmem:[%s3154_s6 + $0xcc] sm:$0xf] }
 0x211   : > { %v786_v37 = vmax.f32 %v771_v35, 0.0  ;;  %v1890_v35 = vld [vmem:[%s3154_s6 + $0x8] sm:$0xf] }
 0x213   : > { %v792_v39 = vmax.f32 %v785_v32, %v786_v37  ;;  %v2762_v32 = vor.u32 %v2100_v31, %v1980_v34  ;;  %v2764_v37 = vor.u32 %v2079_v36, %v1890_v35  ;;  %v1988_v31 = vld [vmem:[%s3154_s6 + $0xd8] sm:$0xf0]  ;;  %v2097_v35 = vld [vmem:[%s3154_s6 + $0xac] sm:$0xf] }
 0x214   : > { %v2897_v34 = vor.u32 %v2101_v30, %v1988_v31  ;;  %v1972_v36 = vld [vmem:[%s3154_s6 + $0xb8] sm:$0xf0] }
 0x215   : > { %v2596_v40 = vpack.c.bf16 %v792_v39, %v791_v38  ;;  %v1914_v38 = vld [vmem:[%s3154_s6 + $0x40] sm:$0xf]  ;;  %v2086_v39 = vld [vmem:[%s3154_s6 + $0x4c] sm:$0xf0]  ;;  %1162 = vmatpush.bf16.msrb.mxu1 %v2764_v37  ;;  %1282 = vmatpush.bf16.msrb.mxu0 %v2764_v37 }
 0x216   : > { %v2632_v55 = vpop.f32.mrf.mxu1  ;;  %v2781_v46 = vor.u32 %v2086_v39, %v1914_v38  ;;  %v2093_v38 = vld [vmem:[%s3154_s6 + $0x8c] sm:$0xf]  ;;  %v1956_v39 = vld [vmem:[%s3154_s6 + $0x98] sm:$0xf0] }
 0x217   : > { %1872 = vmatmul.msk.bf16.vlgmr.msra.gmra.mxu2 %vm700_vm4, %v2596_v40  ;;  %1874 = vmatmul.msk.bf16.vlgmr.msra.gmra.mxu3 %vm700_vm4, %v2596_v40  ;;  %v774_v50 = vadd.f32 %v2590_v28, %v2632_v55  ;;  %v2921_v41 = vor.u32 %v2093_v38, %v1956_v39 }
 0x218   : > { %1129 = vmatpush.bf16.msra.mxu2 %v2664_v1  ;;  %1142 = vmatpush.bf16.msra.mxu3 %v2732_v25 }
 0x219   : > { %1262 = vmatpush.bf16.msra.mxu1 %v2732_v25  ;;  %1395 = vmatpush.bf16.msra.mxu0 %v2620_v52  ;;  %v787_v0 = vmax.f32 %v774_v50, 0.0  ;;  %v1924_v50 = vld [vmem:[%s3154_s6 + $0x58] sm:$0xf0] }
 0x21a   : > { %1163 = vmatmul.bf16.vlgmr.msrb.gmra.mxu1 %v2334_v62 }
 0x21c   : > { %1130 = vmatpush.bf16.msra.mxu2 %v2687_v3  ;;  %1143 = vmatpush.bf16.msra.mxu3 %v2762_v32 }
 0x21d   : > { %1263 = vmatpush.bf16.msra.mxu1 %v2762_v32  ;;  %1396 = vmatpush.bf16.msra.mxu0 %v2630_v54 }
 0x21e   : > { %v775_v16 = vpop.f32.mrf.mxu1 }
 0x21f   : > { %v776_v45 = vadd.f32 %v2590_v28, %v775_v16  ;;  %v2080_v16 = vld [vmem:[%s3154_s6 + $0x24] sm:$0xf] }
 0x220   : > { %1131 = vmatpush.bf16.msra.mxu2 %v2706_v11  ;;  %1144 = vmatpush.bf16.msra.mxu3 %v2784_v47  ;;  %v2860_v19 = vor.u32 %v2080_v16, %v1900_v18 }
 0x221   : > { %v788_v55 = vmax.f32 %v776_v45, 0.0  ;;  %1264 = vmatpush.bf16.msra.mxu1 %v2784_v47  ;;  %1397 = vmatpush.bf16.msra.mxu0 %v2642_v58  ;;  %v1940_v45 = vld [vmem:[%s3154_s6 + $0x78] sm:$0xf0] }
 0x222   : > { %v2932_v48 = vor.u32 %v2089_v44, %v1940_v45 }
 0x223   : > { %v793_v2 = vmax.f32 %v787_v0, %v788_v55  ;;  %v2077_v55 = vld [vmem:[%s3154_s6 + $0xc] sm:$0xf] }
 0x224   : > { %1132 = vmatpush.bf16.msra.mxu2 %v2721_v20  ;;  %1145 = vmatpush.bf16.msra.mxu3 %v2811_v63 }
 0x225   : > { %1265 = vmatpush.bf16.msra.mxu1 %v2811_v63  ;;  %1398 = vmatpush.bf16.msra.mxu0 %v2675_v7 }
 0x228   : > { %1133 = vmatpush.bf16.msra.mxu2 %v2750_v33  ;;  %1146 = vmatpush.bf16.msra.mxu3 %v2833_v12 }
 0x229   : > { %1266 = vmatpush.bf16.msra.mxu1 %v2833_v12  ;;  %1399 = vmatpush.bf16.msra.mxu0 %v2690_v59 }
 0x22c   : > { %1134 = vmatpush.bf16.msra.mxu2 %v2781_v46  ;;  %1147 = vmatpush.bf16.msra.mxu3 %v2849_v15 }
 0x22d   : > { %1267 = vmatpush.bf16.msra.mxu1 %v2849_v15  ;;  %1400 = vmatpush.bf16.msra.mxu0 %v2709_v17 }
 0x230   : > { %1135 = vmatpush.bf16.msra.mxu2 %v2807_v61  ;;  %1148 = vmatpush.bf16.msra.mxu3 %v2860_v19 }
 0x231   : > { %1268 = vmatpush.bf16.msra.mxu1 %v2860_v19  ;;  %1401 = vmatpush.bf16.msra.mxu0 %v2738_v27 }
 0x234   : > { %1136 = vmatpush.bf16.msra.mxu2 %v2825_v8  ;;  %1149 = vmatpush.bf16.msra.mxu3 %v2871_v23 }
 0x235   : > { %1269 = vmatpush.bf16.msra.mxu1 %v2871_v23  ;;  %1402 = vmatpush.bf16.msra.mxu0 %v2764_v37 }
 0x237   : > { %v778_v24 = vpop.f32.mrf.mxu1 }
 0x238   : > { %v779_v53 = vadd.f32 %v2590_v28, %v778_v24  ;;  %v2105_v24 = vld [vmem:[%s3154_s6 + $0xec] sm:$0xf] }
 0x239   : > { %v2881_v29 = vor.u32 %v2105_v24, %v2004_v26  ;;  %1382 = vmatpush.bf16.msrb.mxu1 %v2732_v25 }
 0x23a   : > { %v789_v51 = vmax.f32 %v779_v53, 0.0  ;;  %v2946_v53 = vor.u32 %v2085_v49, %v1924_v50 }
 0x23d   : > { %1383 = vmatpush.bf16.msrb.mxu1 %v2762_v32 }
 0x23f   : > { %v780_v57 = vpop.f32.mrf.mxu1 }
 0x240   : > { %v781_v60 = vadd.f32 %v2590_v28, %v780_v57  ;;  %v2957_v57 = vor.u32 %v2081_v42, %v1908_v56 }
 0x241   : > { %1384 = vmatpush.bf16.msrb.mxu1 %v2784_v47 }
 0x242   : > { %v790_v43 = vmax.f32 %v781_v60, 0.0  ;;  %v1892_v60 = vld [vmem:[%s3154_s6 + $0x18] sm:$0xf0] }
 0x243   : > { %v2968_v0 = vor.u32 %v2077_v55, %v1892_v60 }
 0x244   : > { %v794_v28 = vmax.f32 %v789_v51, %v790_v43  ;;  %v805_v43 = vld [vmem:[%s3155_s7] sm:$0xf] }
 0x245   : > { %1385 = vmatpush.bf16.msrb.mxu1 %v2811_v63  ;;  %v810_v38 = vperm.slane %v805_v43, 3 }
 0x246   : > { %v2823_v6 = vpack.c.bf16 %v794_v28, %v793_v2  ;;  %v807_v2 = vperm.slane %v805_v43, 0  ;;  %v808_v28 = vperm.slane %v805_v43, 1 }
 0x248   : > { %1873 = vmatmul.msk.bf16.gmra.mxu2 %vm700_vm4, %v2823_v6  ;;  %1875 = vmatmul.msk.bf16.gmra.mxu3 %vm700_vm4, %v2823_v6 }
 0x249   : > { %1386 = vmatpush.bf16.msrb.mxu1 %v2833_v12 }
 0x24d   : > { %1387 = vmatpush.bf16.msrb.mxu1 %v2849_v15 }
 0x251   : > { %1388 = vmatpush.bf16.msrb.mxu1 %v2860_v19 }
 0x255   : > { %1389 = vmatpush.bf16.msrb.mxu1 %v2871_v23 }
 0x258   : > { %1876 = vmatmul.msk.bf16.vlgmr.msrb.gmra.mxu2 %vm700_vm4, %v2596_v40  ;;  %1878 = vmatmul.msk.bf16.vlgmr.msrb.gmra.mxu3 %vm700_vm4, %v2596_v40  ;;  %v2910_v40 = vor.u32 %v2097_v35, %v1972_v36  ;;  %v809_v36 = vperm.slane %v805_v43, 2 }
 0x259   : > { %1168 = vmatpush.bf16.msrb.mxu2 %v2881_v29  ;;  %1249 = vmatpush.bf16.msrb.mxu3 %v2664_v1 }
 0x25d   : > { %1169 = vmatpush.bf16.msrb.mxu2 %v2897_v34  ;;  %1250 = vmatpush.bf16.msrb.mxu3 %v2687_v3 }
 0x261   : > { %1170 = vmatpush.bf16.msrb.mxu2 %v2910_v40  ;;  %1251 = vmatpush.bf16.msrb.mxu3 %v2706_v11 }
 0x265   : > { %1171 = vmatpush.bf16.msrb.mxu2 %v2921_v41  ;;  %1252 = vmatpush.bf16.msrb.mxu3 %v2721_v20 }
 0x268   : > { %1877 = vmatmul.msk.bf16.gmra.mxu2 %vm700_vm4, %v2823_v6  ;;  %1879 = vmatmul.msk.bf16.gmra.mxu3 %vm700_vm4, %v2823_v6 }
 0x269   : > { %1172 = vmatpush.bf16.msrb.mxu2 %v2932_v48  ;;  %1253 = vmatpush.bf16.msrb.mxu3 %v2750_v33 }
 0x26d   : > { %1173 = vmatpush.bf16.msrb.mxu2 %v2946_v53  ;;  %1254 = vmatpush.bf16.msrb.mxu3 %v2781_v46 }
 0x271   : > { %1174 = vmatpush.bf16.msrb.mxu2 %v2957_v57  ;;  %1255 = vmatpush.bf16.msrb.mxu3 %v2807_v61 }
 0x275   : > { %1175 = vmatpush.bf16.msrb.mxu2 %v2968_v0  ;;  %1256 = vmatpush.bf16.msrb.mxu3 %v2825_v8 }
 0x278   : > { %1137 = vmatmul.bf16.vlgmr.msra.gmra.mxu2 %v2334_v62  ;;  %1150 = vmatmul.bf16.vlgmr.msra.gmra.mxu3 %v2334_v62 }
 0x279   : > { %1288 = vmatpush.bf16.msra.mxu2 %v2881_v29  ;;  %1369 = vmatpush.bf16.msra.mxu3 %v2664_v1 }
 0x27d   : > { %1289 = vmatpush.bf16.msra.mxu2 %v2897_v34  ;;  %1370 = vmatpush.bf16.msra.mxu3 %v2687_v3 }
 0x281   : > { %1290 = vmatpush.bf16.msra.mxu2 %v2910_v40  ;;  %1371 = vmatpush.bf16.msra.mxu3 %v2706_v11 }
 0x285   : > { %1291 = vmatpush.bf16.msra.mxu2 %v2921_v41  ;;  %1372 = vmatpush.bf16.msra.mxu3 %v2721_v20 }
 0x288   : > { %1176 = vmatmul.bf16.vlgmr.msrb.gmra.mxu2 %v2334_v62 }
 0x289   : > { %1292 = vmatpush.bf16.msra.mxu2 %v2932_v48  ;;  %1373 = vmatpush.bf16.msra.mxu3 %v2750_v33 }
 0x28d   : > { %1293 = vmatpush.bf16.msra.mxu2 %v2946_v53  ;;  %1374 = vmatpush.bf16.msra.mxu3 %v2781_v46 }
 0x291   : > { %1294 = vmatpush.bf16.msra.mxu2 %v2957_v57  ;;  %1375 = vmatpush.bf16.msra.mxu3 %v2807_v61 }
 0x295   : > { %1295 = vmatpush.bf16.msra.mxu2 %v2968_v0  ;;  %1376 = vmatpush.bf16.msra.mxu3 %v2825_v8 }
 0x297   : > { %v1164_v10 = vpop.f32.mrf.mxu1 }
 0x299   : > { %1408 = vmatpush.bf16.msrb.mxu2 %v2881_v29 }
 0x29a   : > { %v870_v51 = vpop.f32.mrf.mxu2  ;;  %v889_v62 = vpop.f32.mrf.mxu3 }
 0x29b   : > { %v890_v43 = vadd.f32 %v889_v62, %v808_v28 }
 0x29d   : > { %1409 = vmatpush.bf16.msrb.mxu2 %v2897_v34 }
 0x29f   : > { %v1166_v13 = vpop.f32.mrf.mxu1 }
 0x2a1   : > { %1410 = vmatpush.bf16.msrb.mxu2 %v2910_v40 }
 0x2a2   : > { %v872_v4 = vpop.f32.mrf.mxu2  ;;  %v891_v5 = vpop.f32.mrf.mxu3 }
 0x2a3   : > { %v3002_v6 = vadd.f32 %v872_v4, %v807_v2  ;;  %v3004_v9 = vadd.f32 %v891_v5, %v808_v28 }
 0x2a5   : > { %1411 = vmatpush.bf16.msrb.mxu2 %v2921_v41 }
 0x2a9   : > { %1412 = vmatpush.bf16.msrb.mxu2 %v2932_v48 }
 0x2ad   : > { %1413 = vmatpush.bf16.msrb.mxu2 %v2946_v53 }
 0x2b1   : > { %1414 = vmatpush.bf16.msrb.mxu2 %v2957_v57 }
 0x2b5   : > { %1415 = vmatpush.bf16.msrb.mxu2 %v2968_v0 }
 0x2cb   : > { %v875_v14 = vpop.f32.mrf.mxu2  ;;  %v894_v16 = vpop.f32.mrf.mxu3 }
 0x2cc   : > { %v3010_v18 = vadd.f32 %v875_v14, %v807_v2  ;;  %v3012_v21 = vadd.f32 %v894_v16, %v808_v28  ;;  %v871_v14 = vadd.f32 %v870_v51, %v807_v2 }
 0x2ce   : > { %3165 = vst [vmem:[#allocation6_spill] sm:$0xff] %v3010_v18 }
 0x2d3   : > { %v877_v22 = vpop.f32.mrf.mxu2  ;;  %v896_v24 = vpop.f32.mrf.mxu3 }
 0x2d4   : > { %v3014_v26 = vadd.f32 %v877_v22, %v807_v2  ;;  %v3016_v30 = vadd.f32 %v896_v24, %v808_v28 }
 0x2d6   : > { %3166 = vst [vmem:[#allocation7_spill] sm:$0xff] %v3014_v26 }
 0x2d7   : > { %3167 = vst [vmem:[#allocation8_spill] sm:$0xff] %v3016_v30 }
 0x2db   : > { %v908_v31 = vpop.f32.mrf.mxu2  ;;  %v927_v35 = vpop.f32.mrf.mxu3 }
 0x2e3   : > { %v910_v39 = vpop.f32.mrf.mxu2  ;;  %v929_v44 = vpop.f32.mrf.mxu3 }
 0x2e4   : > { %v3018_v45 = vadd.f32 %v910_v39, %v809_v36  ;;  %v3020_v49 = vadd.f32 %v929_v44, %v810_v38 }
 0x2eb   : > { %v913_v50 = vpop.f32.mrf.mxu2  ;;  %v932_v42 = vpop.f32.mrf.mxu3 }
 0x2ec   : > { %v3022_v56 = vadd.f32 %v913_v50, %v809_v36  ;;  %v3024_v55 = vadd.f32 %v932_v42, %v810_v38 }
 0x2ee   : > { %3168 = vst [vmem:[#allocation9_spill] sm:$0xff] %v3022_v56 }
 0x2ef   : > { %3169 = vst [vmem:[#allocation10_spill] sm:$0xff] %v3024_v55 }
 0x2f3   : > { %v915_v60 = vpop.f32.mrf.mxu2  ;;  %v934_v4 = vpop.f32.mrf.mxu3 }
 0x2f4   : > { %v3026_v5 = vadd.f32 %v915_v60, %v809_v36  ;;  %v3028_v13 = vadd.f32 %v934_v4, %v810_v38  ;;  %v928_v60 = vadd.f32 %v927_v35, %v810_v38  ;;  %v909_v4 = vadd.f32 %v908_v31, %v809_v36 }
 0x2fb   : > { %v1138_v16 = vpop.f32.mrf.mxu2  ;;  %v1151_v22 = vpop.f32.mrf.mxu3 }
 0x2fc   : > { %v1181_v24 = vadd.f32 %v1138_v16, %v871_v14  ;;  %v1182_v39 = vadd.f32 %v1151_v22, %v890_v43  ;;  %v1183_v14 = vadd.f32 %v1164_v10, %v909_v4 }
 0x2fe   : > { %v2008_v44 = vmul.f32 -1.442695, %v1181_v24  ;;  %v2009_v26 = vmul.f32 -1.442695, %v1182_v39 }
 0x300   : > { %2203 = vpow2.f32 %v2008_v44 }
 0x301   : > { %2205 = vpow2.f32 %v2009_v26 }
 0x303   : > { %v1140_v50 = vpop.f32.mrf.mxu2  ;;  %v1153_v30 = vpop.f32.mrf.mxu3 }
 0x306   : > { %v2204_v42 = vpop.eup %2203 }
 0x307   : > { %v2206_v56 = vpop.eup %2205  ;;  %v1188_v55 = vadd.f32 1.0, %v2204_v42 }
 0x308   : > { %v1207_v18 = vadd.f32 1.0, %v2206_v56 }
 0x309   : > { %2207 = vrcp.f32 %v1188_v55  ;;  %v1200_v30 = vand.u32 2147483648, %v1188_v55  ;;  %v1198_v56 = vand.u32 2147483647, %v1188_v55  ;;  %vm1194_vm8 = vweird.f32 %v1188_v55 }
 0x30a   : > { %2209 = vrcp.f32 %v1207_v18  ;;  %v1219_v35 = vand.u32 2147483648, %v1207_v18  ;;  %v1217_v31 = vand.u32 2147483647, %v1207_v18  ;;  %vm1213_vm10 = vweird.f32 %v1207_v18 }
 0x30b   : > { %v1177_v51 = vpop.f32.mrf.mxu2  ;;  %v1201_v10 = vor.u32 1.1754944e-38, %v1200_v30  ;;  %vm1199_vm11 = vcmp.eq.f32.partialorder %v1198_v56, 8.507059e+37 }
 0x30c   : > { %v1184_v62 = vadd.f32 %v1177_v51, %v928_v60  ;;  %v1220_v51 = vor.u32 1.1754944e-38, %v1219_v35  ;;  %vm1218_vm13 = vcmp.eq.f32.partialorder %v1217_v31, 8.507059e+37 }
 0x30e   : > { %v2010_v2 = vmul.f32 -1.442695, %v1184_v62 }
 0x30f   : > { %v2208_v28 = vpop.eup %2207 }
 0x310   : > { %v2210_v43 = vpop.eup %2209  ;;  %v1190_v16 = vmul.f32 %v2208_v28, %v1188_v55  ;;  %2211 = vpow2.f32 %v2010_v2  ;;  %vm1195_vm6 = vweird.f32 %v2208_v28 }
 0x311   : > { %v1209_v22 = vmul.f32 %v2210_v43, %v1207_v18  ;;  %2213 = vtanh.f32 %v1183_v14  ;;  %vm1214_vm7 = vweird.f32 %v2210_v43  ;;  %vm1196_vm9 = vmor %vm1194_vm8, %vm1195_vm6 }
 0x312   : > { %v1191_v26 = vsub.f32 1.0, %v1190_v16  ;;  %vm1215_vm12 = vmor %vm1213_vm10, %vm1214_vm7 }
 0x313   : > { %v1210_v24 = vsub.f32 1.0, %v1209_v22  ;;  %v1179_v39 = vpop.f32.mrf.mxu2 }
 0x314   : > { %v1192_v44 = vmul.f32 %v2208_v28, %v1191_v26 }
 0x315   : > { %v1211_v38 = vmul.f32 %v2210_v43, %v1210_v24 }
 0x316   : > { %v2212_v36 = vpop.eup %2211  ;;  %v1193_v50 = vadd.f32 %v2208_v28, %v1192_v44 }
 0x317   : > { %v1212_v42 = vadd.f32 %v2210_v43, %v1211_v38  ;;  %v1227_v60 = vadd.f32 1.0, %v2212_v36  ;;  %v2214_v62 = vpop.eup %2213 }
 0x318   : > { %v1197_v4 = vsel %vm1196_vm9, %v2208_v28, %v1193_v50 }
 0x319   : > { %v1202_v2 = vsel %vm1199_vm11, %v1201_v10, %v1197_v4  ;;  %v1216_v14 = vsel %vm1215_vm12, %v2210_v43, %v1212_v42  ;;  %2215 = vrcp.f32 %v1227_v60  ;;  %v1239_v44 = vand.u32 2147483648, %v1227_v60 }
 0x31a   : > { %v1221_v16 = vsel %vm1218_vm13, %v1220_v51, %v1216_v14  ;;  %v1244_v22 = vmul.f32 %v2214_v62, %v1202_v2  ;;  %v1237_v28 = vand.u32 2147483647, %v1227_v60  ;;  %vm1233_vm15 = vweird.f32 %v1227_v60 }
 0x31b   : > { %v1243_v26 = vmul.f32 0.0, %v1221_v16  ;;  %v1240_v43 = vor.u32 1.1754944e-38, %v1239_v44 }
 0x31c   : > { %vm1238_vm1 = vcmp.eq.f32.partialorder %v1237_v28, 8.507059e+37 }
 0x31d   : > { %v3030_v24 = vadd.f32 %v1244_v22, %v1243_v26 }
 0x31f   : > { %v2216_v55 = vpop.eup %2215  ;;  %2217 = vtanh.f32 %v3030_v24 }
 0x320   : > { %v1229_v39 = vmul.f32 %v2216_v55, %v1227_v60  ;;  %vm1234_vm14 = vweird.f32 %v2216_v55 }
 0x321   : > { %vm1235_vm0 = vmor %vm1233_vm15, %vm1234_vm14 }
 0x322   : > { %v1230_v30 = vsub.f32 1.0, %v1229_v39 }
 0x324   : > { %v1231_v18 = vmul.f32 %v2216_v55, %v1230_v30 }
 0x325   : > { %v2218_v38 = vpop.eup %2217 }
 0x326   : > { %v1232_v56 = vadd.f32 %v2216_v55, %v1231_v18 }
 0x328   : > { %v1236_v35 = vsel %vm1235_vm0, %v2216_v55, %v1232_v56 }
 0x329   : > { %v1241_v31 = vsel %vm1238_vm1, %v1240_v43, %v1236_v35 }
 0x32a   : > { %v1247_v36 = vmul.f32 %v2218_v38, %v1241_v31 }
 0x32c   : > { %v1248_v50 = vpack.c.bf16 %v1247_v36, %v1247_v36 }
 0x32e   : > { %1257 = vmatmul.bf16.vlgmr.msrb.gmra.mxu3 %v1248_v50  ;;  %1270 = vmatmul.bf16.vlgmr.msra.gmra.mxu1 %v1248_v50 }
 0x32f   : > { %1283 = vmatmul.bf16.vlgmr.msrb.gmra.mxu0 %v1248_v50  ;;  %1296 = vmatmul.bf16.vlgmr.msra.gmra.mxu2 %v1248_v50 }
 0x330   : > { %1489 = vmatpush.bf16.msrb.mxu3 %v2664_v1  ;;  %1502 = vmatpush.bf16.msra.mxu1 %v2732_v25 }
 0x331   : > { %1515 = vmatpush.bf16.msrb.mxu0 %v2620_v52  ;;  %1528 = vmatpush.bf16.msra.mxu2 %v2881_v29 }
 0x334   : > { %1490 = vmatpush.bf16.msrb.mxu3 %v2687_v3  ;;  %1503 = vmatpush.bf16.msra.mxu1 %v2762_v32 }
 0x335   : > { %1516 = vmatpush.bf16.msrb.mxu0 %v2630_v54  ;;  %1529 = vmatpush.bf16.msra.mxu2 %v2897_v34 }
 0x338   : > { %1491 = vmatpush.bf16.msrb.mxu3 %v2706_v11  ;;  %1504 = vmatpush.bf16.msra.mxu1 %v2784_v47 }
 0x339   : > { %1517 = vmatpush.bf16.msrb.mxu0 %v2642_v58  ;;  %1530 = vmatpush.bf16.msra.mxu2 %v2910_v40 }
 0x33c   : > { %1492 = vmatpush.bf16.msrb.mxu3 %v2721_v20  ;;  %1505 = vmatpush.bf16.msra.mxu1 %v2811_v63 }
 0x33d   : > { %1518 = vmatpush.bf16.msrb.mxu0 %v2675_v7  ;;  %1531 = vmatpush.bf16.msra.mxu2 %v2921_v41 }
 0x340   : > { %1493 = vmatpush.bf16.msrb.mxu3 %v2750_v33  ;;  %1506 = vmatpush.bf16.msra.mxu1 %v2833_v12 }
 0x341   : > { %1519 = vmatpush.bf16.msrb.mxu0 %v2690_v59  ;;  %1532 = vmatpush.bf16.msra.mxu2 %v2932_v48 }
 0x344   : > { %1494 = vmatpush.bf16.msrb.mxu3 %v2781_v46  ;;  %1507 = vmatpush.bf16.msra.mxu1 %v2849_v15 }
 0x345   : > { %1520 = vmatpush.bf16.msrb.mxu0 %v2709_v17  ;;  %1533 = vmatpush.bf16.msra.mxu2 %v2946_v53 }
 0x348   : > { %1495 = vmatpush.bf16.msrb.mxu3 %v2807_v61  ;;  %1508 = vmatpush.bf16.msra.mxu1 %v2860_v19 }
 0x349   : > { %1521 = vmatpush.bf16.msrb.mxu0 %v2738_v27  ;;  %1534 = vmatpush.bf16.msra.mxu2 %v2957_v57 }
 0x34c   : > { %1496 = vmatpush.bf16.msrb.mxu3 %v2825_v8  ;;  %1509 = vmatpush.bf16.msra.mxu1 %v2871_v23 }
 0x34d   : > { %1522 = vmatpush.bf16.msrb.mxu0 %v2764_v37  ;;  %1535 = vmatpush.bf16.msra.mxu2 %v2968_v0 }
 0x3ab   : > { %v1271_v52 = vpop.f32.mrf.mxu1 }
 0x3ac   : > { %v1302_v54 = vadd.f32 %v1271_v52, %v3004_v9  ;;  %v1284_v58 = vpop.f32.mrf.mxu0 }
 0x3ad   : > { %v1303_v34 = vadd.f32 %v1284_v58, %v3018_v45  ;;  %v3170_v58 = vld [vmem:[#allocation6_spill] sm:$0xff] }
 0x3ae   : > { %v2012_v1 = vmul.f32 -1.442695, %v1302_v54 }
 0x3b0   : > { %2219 = vpow2.f32 %v2012_v1 }
 0x3b1   : > { %v1258_v7 = vpop.f32.mrf.mxu3 }
 0x3b2   : > { %v1301_v3 = vadd.f32 %v1258_v7, %v3002_v6  ;;  %v1297_v59 = vpop.f32.mrf.mxu2 }
 0x3b3   : > { %v1304_v11 = vadd.f32 %v1297_v59, %v3020_v49  ;;  %v1273_v17 = vpop.f32.mrf.mxu1 }
 0x3b4   : > { %v2011_v20 = vmul.f32 -1.442695, %v1301_v3  ;;  %v1286_v25 = vpop.f32.mrf.mxu0  ;;  %v3171_v3 = vld [vmem:[#allocation10_spill] sm:$0xff] }
 0x3b5   : > { %v2013_v27 = vmul.f32 -1.442695, %v1304_v11 }
 0x3b6   : > { %v2220_v33 = vpop.eup %2219  ;;  %2221 = vpow2.f32 %v2011_v20 }
 0x3b7   : > { %v1327_v32 = vadd.f32 1.0, %v2220_v33  ;;  %2223 = vpow2.f32 %v2013_v27 }
 0x3b9   : > { %2225 = vrcp.f32 %v1327_v32  ;;  %v1260_v37 = vpop.f32.mrf.mxu3  ;;  %v1339_v53 = vand.u32 2147483648, %v1327_v32  ;;  %vm1333_vm3 = vweird.f32 %v1327_v32  ;;  %v1337_v0 = vand.u32 2147483647, %v1327_v32 }
 0x3ba   : > { %v1299_v46 = vpop.f32.mrf.mxu2 }
 0x3bb   : > { %v1340_v60 = vor.u32 1.1754944e-38, %v1339_v53  ;;  %vm1338_vm6 = vcmp.eq.f32.partialorder %v1337_v0, 8.507059e+37 }
 0x3bc   : > { %v2222_v47 = vpop.eup %2221 }
 0x3bd   : > { %v2224_v61 = vpop.eup %2223  ;;  %v1308_v63 = vadd.f32 1.0, %v2222_v47 }
 0x3be   : > { %v1347_v8 = vadd.f32 1.0, %v2224_v61 }
 0x3bf   : > { %v2226_v12 = vpop.eup %2225  ;;  %2227 = vrcp.f32 %v1308_v63  ;;  %v1320_v9 = vand.u32 2147483648, %v1308_v63  ;;  %v1318_v42 = vand.u32 2147483647, %v1308_v63  ;;  %vm1314_vm7 = vweird.f32 %v1308_v63 }
 0x3c0   : > { %v1329_v15 = vmul.f32 %v2226_v12, %v1327_v32  ;;  %2229 = vrcp.f32 %v1347_v8  ;;  %vm1334_vm2 = vweird.f32 %v2226_v12  ;;  %v1359_v44 = vand.u32 2147483648, %v1347_v8 }
 0x3c1   : > { %vm1335_vm4 = vmor %vm1333_vm3, %vm1334_vm2  ;;  %2231 = vtanh.f32 %v1303_v34  ;;  %v1321_v62 = vor.u32 1.1754944e-38, %v1320_v9  ;;  %vm1319_vm9 = vcmp.eq.f32.partialorder %v1318_v42, 8.507059e+37  ;;  %vm1353_vm11 = vweird.f32 %v1347_v8 }
 0x3c2   : > { %v1330_v19 = vsub.f32 1.0, %v1329_v15  ;;  %v1357_v18 = vand.u32 2147483647, %v1347_v8  ;;  %v1360_v56 = vor.u32 1.1754944e-38, %v1359_v44 }
 0x3c4   : > { %v1331_v23 = vmul.f32 %v2226_v12, %v1330_v19  ;;  %vm1358_vm13 = vcmp.eq.f32.partialorder %v1357_v18, 8.507059e+37 }
 0x3c5   : > { %v2228_v29 = vpop.eup %2227 }
 0x3c6   : > { %v2230_v40 = vpop.eup %2229  ;;  %v1332_v41 = vadd.f32 %v2226_v12, %v1331_v23  ;;  %v1310_v48 = vmul.f32 %v2228_v29, %v1308_v63  ;;  %vm1315_vm5 = vweird.f32 %v2228_v29  ;;  %v3172_v23 = vld [vmem:[#allocation9_spill] sm:$0xff] }
 0x3c7   : > { %v1349_v57 = vmul.f32 %v2230_v40, %v1347_v8  ;;  %vm1316_vm8 = vmor %vm1314_vm7, %vm1315_vm5  ;;  %v2232_v14 = vpop.eup %2231  ;;  %vm1354_vm10 = vweird.f32 %v2230_v40 }
 0x3c8   : > { %v1311_v6 = vsub.f32 1.0, %v1310_v48  ;;  %v1336_v49 = vsel %vm1335_vm4, %v2226_v12, %v1332_v41  ;;  %vm1355_vm12 = vmor %vm1353_vm11, %vm1354_vm10 }
 0x3c9   : > { %v1350_v4 = vsub.f32 1.0, %v1349_v57  ;;  %v1341_v51 = vsel %vm1338_vm6, %v1340_v60, %v1336_v49 }
 0x3ca   : > { %v1312_v10 = vmul.f32 %v2228_v29, %v1311_v6  ;;  %v1363_v26 = vmul.f32 %v1341_v51, %v3030_v24 }
 0x3cb   : > { %v1351_v22 = vmul.f32 %v2230_v40, %v1350_v4 }
 0x3cc   : > { %v1313_v45 = vadd.f32 %v2228_v29, %v1312_v10 }
 0x3cd   : > { %v1352_v30 = vadd.f32 %v2230_v40, %v1351_v22 }
 0x3ce   : > { %v1317_v2 = vsel %vm1316_vm8, %v2228_v29, %v1313_v45 }
 0x3cf   : > { %v1322_v16 = vsel %vm1319_vm9, %v1321_v62, %v1317_v2  ;;  %v1356_v28 = vsel %vm1355_vm12, %v2230_v40, %v1352_v30 }
 0x3d0   : > { %v1364_v55 = vmul.f32 %v2232_v14, %v1322_v16  ;;  %v1361_v35 = vsel %vm1358_vm13, %v1360_v56, %v1356_v28 }
 0x3d2   : > { %v3070_v39 = vadd.f32 %v1364_v55, %v1363_v26 }
 0x3d4   : > { %2233 = vtanh.f32 %v3070_v39 }
 0x3da   : > { %v2234_v43 = vpop.eup %2233 }
 0x3db   : > { %v1367_v38 = vmul.f32 %v2234_v43, %v1361_v35 }
 0x3dd   : > { %v1368_v31 = vpack.c.bf16 %v1367_v38, %v1367_v38 }
 0x3df   : > { %1377 = vmatmul.bf16.vlgmr.msra.gmra.mxu3 %v1368_v31  ;;  %1390 = vmatmul.bf16.vlgmr.msrb.gmra.mxu1 %v1368_v31 }
 0x3e0   : > { %1403 = vmatmul.bf16.vlgmr.msra.gmra.mxu0 %v1368_v31  ;;  %1416 = vmatmul.bf16.vlgmr.msrb.gmra.mxu2 %v1368_v31 }
 0x45c   : > { %v1391_v24 = vpop.f32.mrf.mxu1 }
 0x45d   : > { %v1422_v36 = vadd.f32 %v1391_v24, %v3012_v21  ;;  %v1404_v50 = vpop.f32.mrf.mxu0  ;;  %v2114_v24 = vld [vmem:[%s3156_s8 + $0x30] sm:$0xff] }
 0x45e   : > { %v1423_v29 = vadd.f32 %v1404_v50, %v3172_v23 }
 0x45f   : > { %v2015_v52 = vmul.f32 -1.442695, %v1422_v36  ;;  %v2113_v36 = vld [vmem:[%s3156_s8 + $0x28] sm:$0xff] }
 0x461   : > { %2235 = vpow2.f32 %v2015_v52  ;;  %v3173_v52 = vld [vmem:[#allocation8_spill] sm:$0xff] }
 0x462   : > { %v1378_v54 = vpop.f32.mrf.mxu3 }
 0x463   : > { %v1421_v1 = vadd.f32 %v1378_v54, %v3170_v58  ;;  %v1417_v7 = vpop.f32.mrf.mxu2 }
 0x464   : > { %v1424_v59 = vadd.f32 %v1417_v7, %v3171_v3  ;;  %v1393_v11 = vpop.f32.mrf.mxu1  ;;  %v2111_v3 = vld [vmem:[%s3156_s8 + $0x18] sm:$0xff] }
 0x465   : > { %v2014_v17 = vmul.f32 -1.442695, %v1421_v1  ;;  %v1406_v20 = vpop.f32.mrf.mxu0  ;;  %v2112_v1 = vld [vmem:[%s3156_s8 + $0x20] sm:$0xff]  ;;  %v3174_v11 = vld [vmem:[#allocation7_spill] sm:$0xff] }
 0x466   : > { %v2016_v25 = vmul.f32 -1.442695, %v1424_v59 }
 0x467   : > { %v2236_v27 = vpop.eup %2235  ;;  %2237 = vpow2.f32 %v2014_v17 }
 0x468   : > { %v1447_v33 = vadd.f32 1.0, %v2236_v27  ;;  %2239 = vpow2.f32 %v2016_v25  ;;  %v2110_v25 = vld [vmem:[%s3156_s8 + $0x10] sm:$0xff] }
 0x46a   : > { %2241 = vrcp.f32 %v1447_v33  ;;  %v1380_v32 = vpop.f32.mrf.mxu3  ;;  %v1459_v48 = vand.u32 2147483648, %v1447_v33  ;;  %vm1453_vm15 = vweird.f32 %v1447_v33  ;;  %v1457_v57 = vand.u32 2147483647, %v1447_v33 }
 0x46b   : > { %v1419_v21 = vpop.f32.mrf.mxu2 }
 0x46c   : > { %v1460_v42 = vor.u32 1.1754944e-38, %v1459_v48  ;;  %vm1458_vm2 = vcmp.eq.f32.partialorder %v1457_v57, 8.507059e+37 }
 0x46d   : > { %v2238_v37 = vpop.eup %2237 }
 0x46e   : > { %v2240_v46 = vpop.eup %2239  ;;  %v1428_v47 = vadd.f32 1.0, %v2238_v37 }
 0x46f   : > { %v1467_v61 = vadd.f32 1.0, %v2240_v46 }
 0x470   : > { %v2242_v63 = vpop.eup %2241  ;;  %2243 = vrcp.f32 %v1428_v47  ;;  %v1440_v6 = vand.u32 2147483648, %v1428_v47  ;;  %v1438_v10 = vand.u32 2147483647, %v1428_v47  ;;  %vm1434_vm3 = vweird.f32 %v1428_v47 }
 0x471   : > { %v1449_v8 = vmul.f32 %v2242_v63, %v1447_v33  ;;  %2245 = vrcp.f32 %v1467_v61  ;;  %vm1454_vm14 = vweird.f32 %v2242_v63  ;;  %v1479_v44 = vand.u32 2147483648, %v1467_v61 }
 0x472   : > { %vm1455_vm0 = vmor %vm1453_vm15, %vm1454_vm14  ;;  %2247 = vtanh.f32 %v1423_v29  ;;  %v1441_v51 = vor.u32 1.1754944e-38, %v1440_v6  ;;  %vm1439_vm5 = vcmp.eq.f32.partialorder %v1438_v10, 8.507059e+37  ;;  %vm1473_vm7 = vweird.f32 %v1467_v61 }
 0x473   : > { %v1450_v12 = vsub.f32 1.0, %v1449_v8  ;;  %v1477_v18 = vand.u32 2147483647, %v1467_v61  ;;  %v1480_v56 = vor.u32 1.1754944e-38, %v1479_v44 }
 0x475   : > { %v1451_v15 = vmul.f32 %v2242_v63, %v1450_v12  ;;  %vm1478_vm9 = vcmp.eq.f32.partialorder %v1477_v18, 8.507059e+37 }
 0x476   : > { %v2244_v19 = vpop.eup %2243 }
 0x477   : > { %v2246_v34 = vpop.eup %2245  ;;  %v1452_v40 = vadd.f32 %v2242_v63, %v1451_v15  ;;  %v1430_v41 = vmul.f32 %v2244_v19, %v1428_v47  ;;  %vm1435_vm1 = vweird.f32 %v2244_v19  ;;  %v2109_v47 = vld [vmem:[%s3156_s8 + $0x8] sm:$0xff] }
 0x478   : > { %v1469_v53 = vmul.f32 %v2246_v34, %v1467_v61  ;;  %vm1436_vm4 = vmor %vm1434_vm3, %vm1435_vm1  ;;  %v2248_v2 = vpop.eup %2247  ;;  %vm1474_vm6 = vweird.f32 %v2246_v34 }
 0x479   : > { %v1431_v0 = vsub.f32 1.0, %v1430_v41  ;;  %v1456_v9 = vsel %vm1455_vm0, %v2242_v63, %v1452_v40  ;;  %vm1475_vm8 = vmor %vm1473_vm7, %vm1474_vm6 }
 0x47a   : > { %v1470_v60 = vsub.f32 1.0, %v1469_v53  ;;  %v1461_v45 = vsel %vm1458_vm2, %v1460_v42, %v1456_v9 }
 0x47b   : > { %v1432_v49 = vmul.f32 %v2244_v19, %v1431_v0  ;;  %v1483_v22 = vmul.f32 %v1461_v45, %v3070_v39  ;;  %v2115_v39 = vld [vmem:[%s3156_s8 + $0x38] sm:$0xff] }
 0x47c   : > { %v1471_v16 = vmul.f32 %v2246_v34, %v1470_v60  ;;  %1677 = vmatpush.bf16.msra.mxu3 %v2115_v39 }
 0x47d   : > { %v1433_v4 = vadd.f32 %v2244_v19, %v1432_v49 }
 0x47e   : > { %v1472_v30 = vadd.f32 %v2246_v34, %v1471_v16 }
 0x47f   : > { %v1437_v62 = vsel %vm1436_vm4, %v2244_v19, %v1433_v4 }
 0x480   : > { %v1442_v14 = vsel %vm1439_vm5, %v1441_v51, %v1437_v62  ;;  %v1476_v28 = vsel %vm1475_vm8, %v2246_v34, %v1472_v30  ;;  %1678 = vmatpush.bf16.msra.mxu3 %v2114_v24 }
 0x481   : > { %v1484_v26 = vmul.f32 %v2248_v2, %v1442_v14  ;;  %v1481_v35 = vsel %vm1478_vm9, %v1480_v56, %v1476_v28 }
 0x483   : > { %v3078_v55 = vadd.f32 %v1484_v26, %v1483_v22 }
 0x484   : > { %1679 = vmatpush.bf16.msra.mxu3 %v2113_v36 }
 0x485   : > { %2249 = vtanh.f32 %v3078_v55 }
 0x488   : > { %1680 = vmatpush.bf16.msra.mxu3 %v2112_v1 }
 0x48b   : > { %v2250_v43 = vpop.eup %2249 }
 0x48c   : > { %v1487_v38 = vmul.f32 %v2250_v43, %v1481_v35  ;;  %1681 = vmatpush.bf16.msra.mxu3 %v2111_v3 }
 0x48e   : > { %v1488_v31 = vpack.c.bf16 %v1487_v38, %v1487_v38 }
 0x490   : > { %1497 = vmatmul.bf16.vlgmr.msrb.gmra.mxu3 %v1488_v31  ;;  %1510 = vmatmul.bf16.vlgmr.msra.gmra.mxu1 %v1488_v31 }
 0x491   : > { %1523 = vmatmul.bf16.vlgmr.msrb.gmra.mxu0 %v1488_v31  ;;  %1536 = vmatmul.bf16.vlgmr.msra.gmra.mxu2 %v1488_v31 }
 0x492   : > { %1682 = vmatpush.bf16.msra.mxu3 %v2110_v25 }
 0x496   : > { %1683 = vmatpush.bf16.msra.mxu3 %v2109_v47 }
 0x50d   : > { %v1511_v50 = vpop.f32.mrf.mxu1 }
 0x50e   : > { %v1542_v54 = vadd.f32 %v1511_v50, %v3173_v52  ;;  %v1524_v58 = vpop.f32.mrf.mxu0 }
 0x50f   : > { %v1543_v53 = vadd.f32 %v1524_v58, %v3026_v5 }
 0x510   : > { %v2018_v7 = vmul.f32 -1.442695, %v1542_v54 }
 0x512   : > { %2251 = vpow2.f32 %v2018_v7 }
 0x513   : > { %v1498_v59 = vpop.f32.mrf.mxu3 }
 0x514   : > { %v1541_v17 = vadd.f32 %v1498_v59, %v3174_v11  ;;  %v1537_v20 = vpop.f32.mrf.mxu2 }
 0x515   : > { %v1544_v27 = vadd.f32 %v1537_v20, %v3028_v13  ;;  %v1513_v33 = vpop.f32.mrf.mxu1  ;;  %v2108_v13 = vld [vmem:[%s3156_s8] sm:$0xff] }
 0x516   : > { %v2017_v32 = vmul.f32 -1.442695, %v1541_v17  ;;  %v1526_v21 = vpop.f32.mrf.mxu0  ;;  %1684 = vmatpush.bf16.msra.mxu3 %v2108_v13 }
 0x517   : > { %v2019_v37 = vmul.f32 -1.442695, %v1544_v27 }
 0x518   : > { %v2252_v46 = vpop.eup %2251  ;;  %2253 = vpow2.f32 %v2017_v32 }
 0x519   : > { %v1567_v61 = vadd.f32 1.0, %v2252_v46  ;;  %2255 = vpow2.f32 %v2019_v37 }
 0x51b   : > { %2257 = vrcp.f32 %v1567_v61  ;;  %v1500_v63 = vpop.f32.mrf.mxu3  ;;  %v1579_v9 = vand.u32 2147483648, %v1567_v61  ;;  %vm1573_vm11 = vweird.f32 %v1567_v61  ;;  %v1577_v10 = vand.u32 2147483647, %v1567_v61 }
 0x51c   : > { %v1539_v8 = vpop.f32.mrf.mxu2 }
 0x51d   : > { %v1580_v62 = vor.u32 1.1754944e-38, %v1579_v9  ;;  %vm1578_vm14 = vcmp.eq.f32.partialorder %v1577_v10, 8.507059e+37 }
 0x51e   : > { %v2254_v12 = vpop.eup %2253 }
 0x51f   : > { %v2256_v15 = vpop.eup %2255  ;;  %v1548_v19 = vadd.f32 1.0, %v2254_v12 }
 0x520   : > { %v1587_v23 = vadd.f32 1.0, %v2256_v15 }
 0x521   : > { %v2258_v29 = vpop.eup %2257  ;;  %2259 = vrcp.f32 %v1548_v19  ;;  %v1560_v60 = vand.u32 2147483648, %v1548_v19  ;;  %v1558_v51 = vand.u32 2147483647, %v1548_v19  ;;  %vm1554_vm15 = vweird.f32 %v1548_v19 }
 0x522   : > { %v1569_v34 = vmul.f32 %v2258_v29, %v1567_v61  ;;  %2261 = vrcp.f32 %v1587_v23  ;;  %vm1574_vm10 = vweird.f32 %v2258_v29  ;;  %v1599_v35 = vand.u32 2147483648, %v1587_v23 }
 0x523   : > { %vm1575_vm12 = vmor %vm1573_vm11, %vm1574_vm10  ;;  %2263 = vtanh.f32 %v1543_v53  ;;  %v1561_v14 = vor.u32 1.1754944e-38, %v1560_v60  ;;  %vm1559_vm1 = vcmp.eq.f32.partialorder %v1558_v51, 8.507059e+37  ;;  %vm1593_vm3 = vweird.f32 %v1587_v23 }
 0x524   : > { %v1570_v40 = vsub.f32 1.0, %v1569_v34  ;;  %v1597_v38 = vand.u32 2147483647, %v1587_v23  ;;  %v1600_v39 = vor.u32 1.1754944e-38, %v1599_v35 }
 0x526   : > { %v1571_v41 = vmul.f32 %v2258_v29, %v1570_v40  ;;  %vm1598_vm5 = vcmp.eq.f32.partialorder %v1597_v38, 8.507059e+37 }
 0x527   : > { %v2260_v48 = vpop.eup %2259 }
 0x528   : > { %v2262_v57 = vpop.eup %2261  ;;  %v1572_v0 = vadd.f32 %v2258_v29, %v1571_v41  ;;  %v1550_v6 = vmul.f32 %v2260_v48, %v1548_v19  ;;  %vm1555_vm13 = vweird.f32 %v2260_v48 }
 0x529   : > { %v1589_v49 = vmul.f32 %v2262_v57, %v1587_v23  ;;  %vm1556_vm0 = vmor %vm1554_vm15, %vm1555_vm13  ;;  %v2264_v26 = vpop.eup %2263  ;;  %vm1594_vm2 = vweird.f32 %v2262_v57 }
 0x52a   : > { %v1551_v42 = vsub.f32 1.0, %v1550_v6  ;;  %v1576_v4 = vsel %vm1575_vm12, %v2258_v29, %v1572_v0  ;;  %vm1595_vm4 = vmor %vm1593_vm3, %vm1594_vm2 }
 0x52b   : > { %v1590_v2 = vsub.f32 1.0, %v1589_v49  ;;  %v1581_v16 = vsel %vm1578_vm14, %v1580_v62, %v1576_v4 }
 0x52c   : > { %v1552_v45 = vmul.f32 %v2260_v48, %v1551_v42  ;;  %v1603_v18 = vmul.f32 %v1581_v16, %v3078_v55  ;;  %v2202_v55 = vld [vmem:[%s3157_s9] ss:$0 sm:$0xff] }
 0x52d   : > { %v1591_v44 = vmul.f32 %v2262_v57, %v1590_v2 }
 0x52e   : > { %v1553_v5 = vadd.f32 %v2260_v48, %v1552_v45 }
 0x52f   : > { %v1592_v43 = vadd.f32 %v2262_v57, %v1591_v44 }
 0x530   : > { %v1557_v22 = vsel %vm1556_vm0, %v2260_v48, %v1553_v5 }
 0x531   : > { %v1562_v30 = vsel %vm1559_vm1, %v1561_v14, %v1557_v22  ;;  %v1596_v31 = vsel %vm1595_vm4, %v2262_v57, %v1592_v43 }
 0x532   : > { %v1604_v28 = vmul.f32 %v2264_v26, %v1562_v30  ;;  %v1601_v36 = vsel %vm1598_vm5, %v1600_v39, %v1596_v31 }
 0x534   : > { %v1605_v56 = vadd.f32 %v1604_v28, %v1603_v18 }
 0x536   : > { %2265 = vtanh.f32 %v1605_v56 }
 0x53c   : > { %v2266_v24 = vpop.eup %2265 }
 0x53d   : > { %v1607_v50 = vmul.f32 %v2266_v24, %v1601_v36 }
 0x53f   : > { %v1608_v52 = vpack.c.bf16 %v1607_v50, %v1607_v50 }
 0x541   : > { %1685 = vmatmul.bf16.vlgmr.msra.gmra.mxu3 %v1608_v52 }
 0x5c4   : > { %v1686_v54 = vpop.f32.mrf.mxu3 }
 0x5c5   : > { %v1687_v58 = vadd.f32 %v2202_v55, %v1686_v54 }
 0x5c7   : > { %1690 = vst [vmem:[%s460_s18] sm:$0xff] %v1687_v58 }
 0x5c8   : > { %2294 = shalt.err (!%p2291_p5)
}
 0x5c9   : > { %2116 = dma.vmem_to_hbm [thread:$0]  (%p2428_p6), %s1705_s21, 128, %s1707_s25, %s1692_s0  }
 0x5cc   : > { %v1688_v1 = vpop.f32.mrf.mxu3 }
 0x5cd PF: > { %s1718_s20 = sand.u32 1, %s2317_s13   ;;  %p2119_p7 = pnand %p1774_p9, %p2432_p8 }
 0x5ce   : > { %s1719_s30 = scalar_lea.sflag [#allocation4], %s1718_s20 }
 0x5cf   : > { %p2120_p10 = pneg %p2119_p7 }
 0x5d1   : > { %2312 = dma.done.wait (%p2120_p10), %s1719_s30, 128  }
 0x5d2   : > { %2314 = vsyncadd (%p2120_p10), %s1719_s30, 4294967168  ;;  %p20_p11 = scmp.ge.s32.totalorder %s2413_s19, 4   ;;  %s3175_s13 = smov %s2321_s14 }
 0x5d3   : > { %s3176_s14 = smov %s2325_s15  ;;  %s3177_s15 = smov %s2426_s22 }
 0x5d4   : > { %s3178_s16 = smov %s2413_s19  ;;  %22 = sbr.rel (!%p20_p11) target bundleno = 6 (0x6), region = 141 }
 0x5d9   :  { %1725 = vsyncpa [#allocation4], 1 }
 0x5da   :  { %1727 = vsyncpa [#allocation4 + $0x1], 1 }

</bundles_post_ra>
